<compile_context>
chip_gen: v6e
topology: v6e:2x2x1
jax: 0.10.0
libtpu: 0.0.40
codegen_flags: <defaults>
</compile_context>

<pallas_src>
import functools

import jax
import jax.numpy as jnp
from jax.experimental import pallas as pl
from jax.experimental.pallas import tpu as pltpu


def _mlp_kernel(x_ref, w1_ref, b1_ref, w2_ref, b2_ref, o_ref, *, compute_dtype):
    # x arrives in its native dtype; cast in-kernel (no extra un-fused XLA pass,
    # no extra HBM traffic).  Weights are already stored in compute_dtype.
    x = x_ref[...].astype(compute_dtype)                                   # (tm, IN)
    h = jnp.dot(x, w1_ref[...], preferred_element_type=jnp.float32)        # MXU, f32 acc
    h = jnp.maximum(h + b1_ref[...], 0.0)                                  # bias + ReLU (VPU)
    h = h.astype(compute_dtype)                                            # feed MXU natively
    o = jnp.dot(h, w2_ref[...], preferred_element_type=jnp.float32)        # (tm, OUT)
    o_ref[...] = (o + b2_ref[...]).astype(o_ref.dtype)


_TM_BUCKETS = (16, 32, 64, 128, 256)


def _num_tensorcores():
    """2 for chips whose parallel grid axes shard across TensorCores (v7x / megacore)."""
    try:
        kind = jax.devices()[0].device_kind.lower()
    except Exception:
        return 1
    if any(tag in kind for tag in ("v7", "v4", "v5p")):
        return 2
    return 1


def _pick_tm(m):
    """Row tile from a fixed bucket set (avoids recompile churn on varying M)."""
    n_tc = _num_tensorcores()
    per_step = max(1, -(-m // n_tc))          # ceil(m / n_tc)
    tm = next((t for t in _TM_BUCKETS if t >= per_step), _TM_BUCKETS[-1])
    if n_tc > 1:
        # Prefer the largest tile (<= tm) whose grid length is a multiple of the
        # TC count -- an odd grid on v7x leaves one core idle part of the time.
        for cand in reversed(_TM_BUCKETS):
            if cand <= tm and (-(-m // cand)) % n_tc == 0:
                return cand
    return tm


def _resident_spec(shape):
    """BlockSpec for a weight/bias that never changes across the grid.

    Constant index map -> the block stays resident in VMEM; Buffered(1) drops the
    (pointless) second pipeline buffer, halving resident weight VMEM (v7x: 64 MiB).
    Falls back to the default spec on jax versions without pipeline_mode.
    """
    try:
        return pl.BlockSpec(shape, lambda i: (0, 0), pipeline_mode=pl.Buffered(1))
    except Exception:
        return pl.BlockSpec(shape, lambda i: (0, 0))


@functools.partial(jax.jit, static_argnames=("tm", "compute_dtype"))
def _rowwise_compressor_impl(x, w1, b1, w2, b2, tm, compute_dtype):
    M, IN = x.shape
    HID = w1.shape[1]
    OUT = w2.shape[1]
    cd = jnp.dtype(compute_dtype)

    # Weights in the MXU feed dtype, biases in f32 (added to the f32 accumulator).
    # (In a serving setting these casts would be folded into weight preparation.)
    w1c = w1.astype(cd)
    w2c = w2.astype(cd)
    b1c = b1.astype(jnp.float32)
    b2c = b2.astype(jnp.float32)

    grid_m = pl.cdiv(M, tm)  # last block may be partial: masked store, rows independent

    # Static VMEM budget: 2x input tile + 1x resident weights + 2x output tile + temps.
    x_tile_bytes = 2 * tm * IN * x.dtype.itemsize
    w_bytes = (IN * HID + HID * OUT) * cd.itemsize
    b_bytes = (HID + OUT) * 4
    o_tile_bytes = 2 * tm * OUT * 4
    tmp_bytes = tm * (IN + 2 * HID + 2 * OUT) * 4
    vmem_need = x_tile_bytes + w_bytes + b_bytes + o_tile_bytes + tmp_bytes
    vmem_limit = int(min(max(int(vmem_need * 1.5), 32 * 1024 * 1024), 64 * 1024 * 1024))

    cost = pl.CostEstimate(
        flops=2 * M * (IN * HID + HID * OUT),
        transcendentals=0,
        bytes_accessed=(M * IN * x.dtype.itemsize
                        + (IN * HID + HID * OUT) * cd.itemsize
                        + (HID + OUT) * 4
                        + M * OUT * 4),
    )

    return pl.pallas_call(
        functools.partial(_mlp_kernel, compute_dtype=cd),
        out_shape=jax.ShapeDtypeStruct((M, OUT), jnp.float32),
        grid_spec=pltpu.PrefetchScalarGridSpec(
            num_scalar_prefetch=0,
            grid=(grid_m,),
            in_specs=[
                pl.BlockSpec((tm, IN), lambda i: (i, 0)),   # x row tile (native dtype)
                _resident_spec((IN, HID)),                  # w1 (resident, single-buffered)
                _resident_spec((1, HID)),                   # b1
                _resident_spec((HID, OUT)),                 # w2
                _resident_spec((1, OUT)),                   # b2
            ],
            out_specs=pl.BlockSpec((tm, OUT), lambda i: (i, 0)),
        ),
        compiler_params=pltpu.CompilerParams(
            dimension_semantics=("parallel",),
            vmem_limit_bytes=vmem_limit,
        ),
        cost_estimate=cost,
    )(x, w1c, b1c, w2c, b2c)


def rowwise_compressor(x, w1, b1, w2, b2, *, tm=None, compute_dtype="bfloat16"):
    """x: (M, IN) any float dtype -> (M, OUT) float32.

    compute_dtype="bfloat16" (default): native-rate MXU path, f32 accumulation.
    compute_dtype="float32": keeps the module's x.float() compute dtype end-to-end.
    """
    if tm is None:
        tm = _pick_tm(x.shape[0])
    return _rowwise_compressor_impl(x, w1, b1, w2, b2, tm,
                                    str(jnp.dtype(compute_dtype)))


def init_params(key, in_features, hidden_features, out_features):
    """Deterministic init mimicking torch.nn.Linear (uniform +-1/sqrt(fan_in)),
    weights stored transposed vs torch: w1 (IN, HID), w2 (HID, OUT)."""
    k1, k2, k3, k4 = jax.random.split(key, 4)
    lim1 = 1.0 / jnp.sqrt(jnp.float32(in_features))
    lim2 = 1.0 / jnp.sqrt(jnp.float32(hidden_features))
    w1 = jax.random.uniform(k1, (in_features, hidden_features), jnp.float32, -lim1, lim1)
    b1 = jax.random.uniform(k2, (1, hidden_features), jnp.float32, -lim1, lim1)
    w2 = jax.random.uniform(k3, (hidden_features, out_features), jnp.float32, -lim2, lim2)
    b2 = jax.random.uniform(k4, (1, out_features), jnp.float32, -lim2, lim2)
    return w1, b1, w2, b2


def _ref(x, w1, b1, w2, b2, compute_dtype=jnp.float32):
    """Pure-JAX reference with the same compute-dtype contract as the kernel."""
    xf = x.astype(jnp.float32).astype(compute_dtype)
    h = jnp.dot(xf, w1.astype(compute_dtype), preferred_element_type=jnp.float32)
    h = jnp.maximum(h + b1.astype(jnp.float32), 0.0).astype(compute_dtype)
    o = jnp.dot(h, w2.astype(compute_dtype), preferred_element_type=jnp.float32)
    return o + b2.astype(jnp.float32)


if __name__ == "__main__":
    # Small shapes consistent with the module (rows of features -> compressed rows);
    # all feature dims lane-aligned (multiples of 128).
    M, IN, HID, OUT = 256, 512, 256, 128

    key = jax.random.PRNGKey(0)
    kx, kp = jax.random.split(key)
    x = jax.random.normal(kx, (M, IN), jnp.bfloat16)       # exercises the in-kernel cast
    w1, b1, w2, b2 = init_params(kp, IN, HID, OUT)

    # Default bf16 MXU path.
    out = jax.block_until_ready(rowwise_compressor(x, w1, b1, w2, b2))
    ref = _ref(x, w1, b1, w2, b2, jnp.bfloat16)
    assert out.shape == (M, OUT) and out.dtype == jnp.float32
    # Tolerance dominated by MXU bf16-pass rounding / accumulation order, not kernel bugs.
    assert jnp.allclose(out, ref, atol=1e-2, rtol=1e-2)

    # f32 compute path + ragged M with a multi-step grid and a partial last block
    # (no wrapper pad/slice: masked output store handles the tail).
    M2 = 200
    x2 = jax.random.normal(jax.random.PRNGKey(1), (M2, IN), jnp.float32)
    out2 = jax.block_until_ready(
        rowwise_compressor(x2, w1, b1, w2, b2, tm=64, compute_dtype="float32"))
    ref2 = _ref(x2, w1, b1, w2, b2, jnp.float32)
    assert out2.shape == (M2, OUT)
    assert jnp.allclose(out2, ref2, atol=1e-2, rtol=1e-2)

    # Ragged M smaller than the auto-picked tile (single partial block).
    M3 = 37
    x3 = jax.random.normal(jax.random.PRNGKey(2), (M3, IN), jnp.bfloat16)
    out3 = jax.block_until_ready(rowwise_compressor(x3, w1, b1, w2, b2))
    ref3 = _ref(x3, w1, b1, w2, b2, jnp.bfloat16)
    assert out3.shape == (M3, OUT)
    assert jnp.allclose(out3, ref3, atol=1e-2, rtol=1e-2)

    print("KERNEL_OK")
</pallas_src>

<mosaic_0001>
module attributes {stable_mosaic.version = 11 : i64} {
  func.func @_mlp_kernel(%arg0: i32, %arg1: memref<256x512xbf16, #tpu.memory_space<vmem>>, %arg2: memref<512x256xbf16, #tpu.memory_space<vmem>>, %arg3: memref<1x256xf32, #tpu.memory_space<vmem>>, %arg4: memref<256x128xbf16, #tpu.memory_space<vmem>>, %arg5: memref<1x128xf32, #tpu.memory_space<vmem>>, %arg6: memref<256x128xf32, #tpu.memory_space<vmem>>) attributes {dimension_semantics = [#tpu.dimension_semantics<parallel>], iteration_bounds = array<i64: 1>, scalar_prefetch = 0 : i64, scratch_operands = 0 : i64, tpu.core_type = #tpu.core_type<tc>, window_params = [{transform_indices = @transform_0, window_bounds = array<i64: 256, 512>}, {pipeline_mode = #tpu.pipeline_mode<synchronous>, transform_indices = @transform_1, window_bounds = array<i64: 512, 256>}, {pipeline_mode = #tpu.pipeline_mode<synchronous>, transform_indices = @transform_2, window_bounds = array<i64: 1, 256>}, {pipeline_mode = #tpu.pipeline_mode<synchronous>, transform_indices = @transform_3, window_bounds = array<i64: 256, 128>}, {pipeline_mode = #tpu.pipeline_mode<synchronous>, transform_indices = @transform_4, window_bounds = array<i64: 1, 128>}, {transform_indices = @transform_5, window_bounds = array<i64: 256, 128>}]} {
    %c0 = arith.constant 0 : index
    %c0_0 = arith.constant 0 : index
    %0 = vector.load %arg1[%c0, %c0_0] : memref<256x512xbf16, #tpu.memory_space<vmem>>, vector<256x512xbf16>
    %c0_1 = arith.constant 0 : index
    %c0_2 = arith.constant 0 : index
    %1 = vector.load %arg2[%c0_1, %c0_2] : memref<512x256xbf16, #tpu.memory_space<vmem>>, vector<512x256xbf16>
    %cst = arith.constant dense<0.000000e+00> : vector<256x256xf32>
    %2 = tpu.matmul %0, %1, %cst {dimension_numbers = #tpu.dot_dimension_numbers<[1], [0], [0], [1], [0, 0, 1, 1], [], []>} : vector<256x512xbf16>, vector<512x256xbf16>, vector<256x256xf32> -> vector<256x256xf32>
    %c0_3 = arith.constant 0 : index
    %c0_4 = arith.constant 0 : index
    %3 = vector.load %arg3[%c0_3, %c0_4] : memref<1x256xf32, #tpu.memory_space<vmem>>, vector<1x256xf32>
    %4 = vector.broadcast %3 : vector<1x256xf32> to vector<256x256xf32>
    %5 = arith.addf %2, %4 : vector<256x256xf32>
    %cst_5 = arith.constant 0.000000e+00 : f32
    %6 = vector.broadcast %cst_5 : f32 to vector<256x256xf32>
    %7 = arith.maximumf %5, %6 : vector<256x256xf32>
    %8 = arith.truncf %7 : vector<256x256xf32> to vector<256x256xbf16>
    %c0_6 = arith.constant 0 : index
    %c0_7 = arith.constant 0 : index
    %9 = vector.load %arg4[%c0_6, %c0_7] : memref<256x128xbf16, #tpu.memory_space<vmem>>, vector<256x128xbf16>
    %cst_8 = arith.constant dense<0.000000e+00> : vector<256x128xf32>
    %10 = tpu.matmul %8, %9, %cst_8 {dimension_numbers = #tpu.dot_dimension_numbers<[1], [0], [0], [1], [0, 0, 1, 1], [], []>} : vector<256x256xbf16>, vector<256x128xbf16>, vector<256x128xf32> -> vector<256x128xf32>
    %c0_9 = arith.constant 0 : index
    %c0_10 = arith.constant 0 : index
    %11 = vector.load %arg5[%c0_9, %c0_10] : memref<1x128xf32, #tpu.memory_space<vmem>>, vector<1x128xf32>
    %12 = vector.broadcast %11 : vector<1x128xf32> to vector<256x128xf32>
    %13 = arith.addf %10, %12 : vector<256x128xf32>
    %c0_11 = arith.constant 0 : index
    %c0_12 = arith.constant 0 : index
    %14 = vector.load %arg6[%c0_11, %c0_12] : memref<256x128xf32, #tpu.memory_space<vmem>>, vector<256x128xf32>
    tpu.vector_store %arg6[%c0_11, %c0_12], %13 {strides = array<i32>} : memref<256x128xf32, #tpu.memory_space<vmem>>, vector<256x128xf32>,
    return
  }
  func.func @transform_0(%arg0: i32) -> (i32, i32) {
    %c0_i32 = arith.constant 0 : i32
    %c0_i32_0 = arith.constant 0 : i32
    return %arg0, %c0_i32 : i32, i32
  }
  func.func @transform_1(%arg0: i32) -> (i32, i32) {
    %c0_i32 = arith.constant 0 : i32
    %c0_i32_0 = arith.constant 0 : i32
    %c0_i32_1 = arith.constant 0 : i32
    return %c0_i32, %c0_i32_0 : i32, i32
  }
  func.func @transform_2(%arg0: i32) -> (i32, i32) {
    %c0_i32 = arith.constant 0 : i32
    %c0_i32_0 = arith.constant 0 : i32
    %c0_i32_1 = arith.constant 0 : i32
    return %c0_i32, %c0_i32_0 : i32, i32
  }
  func.func @transform_3(%arg0: i32) -> (i32, i32) {
    %c0_i32 = arith.constant 0 : i32
    %c0_i32_0 = arith.constant 0 : i32
    %c0_i32_1 = arith.constant 0 : i32
    return %c0_i32, %c0_i32_0 : i32, i32
  }
  func.func @transform_4(%arg0: i32) -> (i32, i32) {
    %c0_i32 = arith.constant 0 : i32
    %c0_i32_0 = arith.constant 0 : i32
    %c0_i32_1 = arith.constant 0 : i32
    return %c0_i32, %c0_i32_0 : i32, i32
  }
  func.func @transform_5(%arg0: i32) -> (i32, i32) {
    %c0_i32 = arith.constant 0 : i32
    %c0_i32_0 = arith.constant 0 : i32
    return %arg0, %c0_i32 : i32, i32
  }
}

</mosaic_0001>

<bundles_post_ra>
// kernel: _rowwise_compressor_impl.1
= control target key start
LH: loop header
LB: loop body
LE: loop exit
PB: predicated region body
PF: predicated region fallthrough
CT: control target
= control target key end

     0   :  { %s2888_s0 = inlined_call_operand.vmem [shape: bf16[256,512], index: 0, kind: input, shape index: {}]   ;;  %s2889_s1 = inlined_call_operand.vmem [shape: bf16[512,256], index: 1, kind: input, shape index: {}]   ;;  %s2890_s2 = inlined_call_operand.vmem [shape: f32[1,256], index: 2, kind: input, shape index: {}]   ;;  %s2891_s3 = inlined_call_operand.vmem [shape: bf16[256,128], index: 3, kind: input, shape index: {}]   ;;  %s2892_s4 = inlined_call_operand.vmem [shape: f32[1,128], index: 4, kind: input, shape index: {}]   ;;  %s2893_s5 = inlined_call_operand.hbm [shape: f32[256,128], index: 5, kind: output, shape index: {}]  }
   0x1   :  { %v1920_v0 = vld [vmem:[%s2889_s1 + $0x74] ss:$8 sps:$4 sm:$0xff]   ;;  %v1922_v1 = vld [vmem:[%s2889_s1 + $0x70] ss:$8 sps:$4 sm:$0xff]   ;;  %v1923_v2 = vld [vmem:[%s2889_s1 + $0x64] ss:$8 sps:$4 sm:$0xff]  }
   0x2   :  { %1885 = vmatprep.subr.bf16.mxu1 %v1920_v0  ;;  %802 = vmatprep.subr.bf16.mxu0 %v1920_v0  ;;  %v1925_v3 = vld [vmem:[%s2889_s1 + $0x60] ss:$8 sps:$4 sm:$0xff]   ;;  %v1926_v4 = vld [vmem:[%s2889_s1 + $0x54] ss:$8 sps:$4 sm:$0xff]   ;;  %v1928_v5 = vld [vmem:[%s2889_s1 + $0x50] ss:$8 sps:$4 sm:$0xff]  }
   0x3   :  { %1901 = vmatpush1.bf16.msra.mxu1 %v1922_v1  ;;  %803 = vmatpush1.bf16.msra.mxu0 %v1922_v1  ;;  %v1929_v6 = vld [vmem:[%s2889_s1 + $0x44] ss:$8 sps:$4 sm:$0xff]   ;;  %v1931_v7 = vld [vmem:[%s2889_s1 + $0x40] ss:$8 sps:$4 sm:$0xff]   ;;  %v1932_v8 = vld [vmem:[%s2889_s1 + $0x34] ss:$8 sps:$4 sm:$0xff]  }
   0x4   :  { %1886 = vmatprep.subr.bf16.mxu1 %v1923_v2  ;;  %804 = vmatprep.subr.bf16.mxu0 %v1923_v2  ;;  %v1934_v9 = vld [vmem:[%s2889_s1 + $0x30] ss:$8 sps:$4 sm:$0xff]   ;;  %v1935_v10 = vld [vmem:[%s2889_s1 + $0x24] ss:$8 sps:$4 sm:$0xff]   ;;  %v1937_v11 = vld [vmem:[%s2889_s1 + $0x20] ss:$8 sps:$4 sm:$0xff]  }
   0x5   :  { %v1938_v12 = vld [vmem:[%s2889_s1 + $0x14] ss:$8 sps:$4 sm:$0xff]   ;;  %v1940_v14 = vld [vmem:[%s2889_s1 + $0x10] ss:$8 sps:$4 sm:$0xff]   ;;  %v1941_v15 = vld [vmem:[%s2889_s1 + $0x4] ss:$8 sps:$4 sm:$0xff]  }
   0x6   :  { %v1970_v13 = vld [vmem:[%s2888_s0 + $0x104] ss:$16 sps:$4 sm:$0xff]   ;;  %v1943_v16 = vld [vmem:[%s2889_s1] ss:$8 sps:$4 sm:$0xff]   ;;  %v1946_v18 = vld [vmem:[%s2889_s1 + $0xf0] ss:$8 sps:$4 sm:$0xff]  }
   0x7   :  { %1902 = vmatpush1.bf16.msra.mxu1 %v1925_v3  ;;  %805 = vmatpush1.bf16.msra.mxu0 %v1925_v3  ;;  %v1944_v17 = vld [vmem:[%s2889_s1 + $0xf4] ss:$8 sps:$4 sm:$0xff]   ;;  %v1947_v19 = vld [vmem:[%s2889_s1 + $0xe4] ss:$8 sps:$4 sm:$0xff]   ;;  %v1949_v20 = vld [vmem:[%s2889_s1 + $0xe0] ss:$8 sps:$4 sm:$0xff]  }
   0x8   :  { %1887 = vmatprep.subr.bf16.mxu1 %v1926_v4  ;;  %806 = vmatprep.subr.bf16.mxu0 %v1926_v4  ;;  %v1950_v21 = vld [vmem:[%s2889_s1 + $0xd4] ss:$8 sps:$4 sm:$0xff]   ;;  %v1952_v22 = vld [vmem:[%s2889_s1 + $0xd0] ss:$8 sps:$4 sm:$0xff]   ;;  %v1953_v23 = vld [vmem:[%s2889_s1 + $0xc4] ss:$8 sps:$4 sm:$0xff]  }
   0x9   :  { %914 = vmatprep.mubr.bf16.mxu1 %v1970_v13  ;;  %v1955_v24 = vld [vmem:[%s2889_s1 + $0xc0] ss:$8 sps:$4 sm:$0xff]   ;;  %v1956_v25 = vld [vmem:[%s2889_s1 + $0xb4] ss:$8 sps:$4 sm:$0xff]   ;;  %v1958_v26 = vld [vmem:[%s2889_s1 + $0xb0] ss:$8 sps:$4 sm:$0xff]  }
   0xa   :  { %v1959_v27 = vld [vmem:[%s2889_s1 + $0xa4] ss:$8 sps:$4 sm:$0xff]   ;;  %v1961_v28 = vld [vmem:[%s2889_s1 + $0xa0] ss:$8 sps:$4 sm:$0xff]   ;;  %v1962_v30 = vld [vmem:[%s2889_s1 + $0x94] ss:$8 sps:$4 sm:$0xff]  }
   0xb   :  { %1903 = vmatpush1.bf16.msra.mxu1 %v1928_v5  ;;  %807 = vmatpush1.bf16.msra.mxu0 %v1928_v5  ;;  %v2035_v29 = vld [vmem:[%s2888_s0 + $0x4] ss:$16 sps:$4 sm:$0xff]   ;;  %v1964_v31 = vld [vmem:[%s2889_s1 + $0x90] ss:$8 sps:$4 sm:$0xff]   ;;  %v1967_v33 = vld [vmem:[%s2889_s1 + $0x80] ss:$8 sps:$4 sm:$0xff]  }
   0xc   :  { %1888 = vmatprep.subr.bf16.mxu1 %v1929_v6  ;;  %808 = vmatprep.subr.bf16.mxu0 %v1929_v6  ;;  %v1965_v32 = vld [vmem:[%s2889_s1 + $0x84] ss:$8 sps:$4 sm:$0xff]   ;;  %v1973_v34 = vld [vmem:[%s2889_s1 + $0x174] ss:$8 sps:$4 sm:$0xff]   ;;  %v1968_v35 = vld [vmem:[%s2888_s0 + $0x100] ss:$16 sps:$4 sm:$0xff]  }
   0xd   :  { %834 = vmatprep.mubr.bf16.mxu0 %v2035_v29  ;;  %v1971_v36 = vld [vmem:[%s2889_s1 + $0x170] ss:$8 sps:$4 sm:$0xff]   ;;  %v1977_v38 = vld [vmem:[%s2888_s0 + $0x124] ss:$16 sps:$4 sm:$0xff]   ;;  %v1974_v41 = vld [vmem:[%s2889_s1 + $0x160] ss:$8 sps:$4 sm:$0xff]  }
   0xe   :  { %v2033_v37 = vld [vmem:[%s2888_s0] ss:$16 sps:$4 sm:$0xff]   ;;  %v1976_v39 = vld [vmem:[%s2889_s1 + $0x164] ss:$8 sps:$4 sm:$0xff]   ;;  %v1982_v42 = vld [vmem:[%s2889_s1 + $0x154] ss:$8 sps:$4 sm:$0xff]  }
   0xf   :  { %1904 = vmatpush1.bf16.msra.mxu1 %v1931_v7  ;;  %809 = vmatpush1.bf16.msra.mxu0 %v1931_v7  ;;  %v2046_v40 = vld [vmem:[%s2888_s0 + $0x24] ss:$16 sps:$4 sm:$0xff]   ;;  %v1979_v43 = vld [vmem:[%s2888_s0 + $0x120] ss:$16 sps:$4 sm:$0xff]  }
  0x10   :  { %1889 = vmatprep.subr.bf16.mxu1 %v1932_v8  ;;  %810 = vmatprep.subr.bf16.mxu0 %v1932_v8  ;;  %v1980_v44 = vld [vmem:[%s2889_s1 + $0x150] ss:$8 sps:$4 sm:$0xff]   ;;  %v1986_v46 = vld [vmem:[%s2888_s0 + $0x144] ss:$16 sps:$4 sm:$0xff]   ;;  %v1983_v49 = vld [vmem:[%s2889_s1 + $0x140] ss:$8 sps:$4 sm:$0xff]  }
  0x11   :  { %v2048_v45 = vld [vmem:[%s2888_s0 + $0x20] ss:$16 sps:$4 sm:$0xff]   ;;  %v1985_v47 = vld [vmem:[%s2889_s1 + $0x144] ss:$8 sps:$4 sm:$0xff]   ;;  %v1991_v51 = vld [vmem:[%s2889_s1 + $0x134] ss:$8 sps:$4 sm:$0xff]  }
  0x12   :  { %v2051_v48 = vld [vmem:[%s2888_s0 + $0x44] ss:$16 sps:$4 sm:$0xff]   ;;  %v1988_v50 = vld [vmem:[%s2888_s0 + $0x140] ss:$16 sps:$4 sm:$0xff]  }
  0x13   :  { %1905 = vmatpush1.bf16.msra.mxu1 %v1934_v9  ;;  %811 = vmatpush1.bf16.msra.mxu0 %v1934_v9  ;;  %v1989_v52 = vld [vmem:[%s2889_s1 + $0x130] ss:$8 sps:$4 sm:$0xff]   ;;  %v1995_v53 = vld [vmem:[%s2888_s0 + $0x164] ss:$16 sps:$4 sm:$0xff]   ;;  %v1992_v57 = vld [vmem:[%s2889_s1 + $0x120] ss:$8 sps:$4 sm:$0xff]  }
  0x14   :  { %1890 = vmatprep.subr.bf16.mxu1 %v1935_v10  ;;  %812 = vmatprep.subr.bf16.mxu0 %v1935_v10  ;;  %v1994_v54 = vld [vmem:[%s2889_s1 + $0x124] ss:$8 sps:$4 sm:$0xff]   ;;  %v2054_v55 = vld [vmem:[%s2888_s0 + $0x40] ss:$16 sps:$4 sm:$0xff]   ;;  %v2000_v58 = vld [vmem:[%s2889_s1 + $0x114] ss:$8 sps:$4 sm:$0xff]  }
  0x15   :  { %v2057_v56 = vld [vmem:[%s2888_s0 + $0x64] ss:$16 sps:$4 sm:$0xff]   ;;  %v1997_v59 = vld [vmem:[%s2888_s0 + $0x160] ss:$16 sps:$4 sm:$0xff]  }
  0x16   :  { %v2060_v60 = vld [vmem:[%s2888_s0 + $0x60] ss:$16 sps:$4 sm:$0xff]   ;;  %v2004_v62 = vld [vmem:[%s2888_s0 + $0x184] ss:$16 sps:$4 sm:$0xff]  }
  0x17   :  { %1906 = vmatpush1.bf16.msra.mxu1 %v1937_v11  ;;  %813 = vmatpush1.bf16.msra.mxu0 %v1937_v11  ;;  %v1998_v61 = vld [vmem:[%s2889_s1 + $0x110] ss:$8 sps:$4 sm:$0xff]   ;;  %v2003_v63 = vld [vmem:[%s2889_s1 + $0x104] ss:$8 sps:$4 sm:$0xff]   ;;  %v2001_v1 = vld [vmem:[%s2889_s1 + $0x100] ss:$8 sps:$4 sm:$0xff]  }
  0x18   :  { %1891 = vmatprep.subr.bf16.mxu1 %v1938_v12  ;;  %814 = vmatprep.subr.bf16.mxu0 %v1938_v12  ;;  %v2063_v0 = vld [vmem:[%s2888_s0 + $0x84] ss:$16 sps:$4 sm:$0xff]   ;;  %v2006_v3 = vld [vmem:[%s2888_s0 + $0x180] ss:$16 sps:$4 sm:$0xff]  }
  0x19   :  { %v2009_v2 = vld [vmem:[%s2889_s1 + $0x1f4] ss:$8 sps:$4 sm:$0xff]   ;;  %v2066_v4 = vld [vmem:[%s2888_s0 + $0x80] ss:$16 sps:$4 sm:$0xff]  }
  0x1b   :  { %1907 = vmatpush1.bf16.msra.mxu1 %v1940_v14  ;;  %815 = vmatpush1.bf16.msra.mxu0 %v1940_v14 }
  0x1c   :  { %1892 = vmatprep.subr.bf16.mxu1 %v1941_v15  ;;  %816 = vmatprep.subr.bf16.mxu0 %v1941_v15 }
  0x1f   :  { %1908 = vmatpush1.bf16.msra.mxu1 %v1943_v16  ;;  %817 = vmatpush1.bf16.msra.mxu0 %v1943_v16 }
  0x20   :  { %1893 = vmatprep.subr.bf16.mxu1 %v1944_v17  ;;  %818 = vmatprep.subr.bf16.mxu0 %v1944_v17 }
  0x23   :  { %1909 = vmatpush2.bf16.msra.mxu1 %v1946_v18  ;;  %819 = vmatpush2.bf16.msra.mxu0 %v1946_v18 }
  0x24   :  { %1894 = vmatprep.subr.bf16.mxu1 %v1947_v19  ;;  %820 = vmatprep.subr.bf16.mxu0 %v1947_v19 }
  0x27   :  { %1910 = vmatpush2.bf16.msra.mxu1 %v1949_v20  ;;  %821 = vmatpush2.bf16.msra.mxu0 %v1949_v20 }
  0x28   :  { %1895 = vmatprep.subr.bf16.mxu1 %v1950_v21  ;;  %822 = vmatprep.subr.bf16.mxu0 %v1950_v21 }
  0x2b   :  { %1911 = vmatpush2.bf16.msra.mxu1 %v1952_v22  ;;  %823 = vmatpush2.bf16.msra.mxu0 %v1952_v22 }
  0x2c   :  { %1896 = vmatprep.subr.bf16.mxu1 %v1953_v23  ;;  %824 = vmatprep.subr.bf16.mxu0 %v1953_v23 }
  0x2f   :  { %1912 = vmatpush2.bf16.msra.mxu1 %v1955_v24  ;;  %825 = vmatpush2.bf16.msra.mxu0 %v1955_v24 }
  0x30   :  { %1897 = vmatprep.subr.bf16.mxu1 %v1956_v25  ;;  %826 = vmatprep.subr.bf16.mxu0 %v1956_v25 }
  0x33   :  { %1913 = vmatpush2.bf16.msra.mxu1 %v1958_v26  ;;  %827 = vmatpush2.bf16.msra.mxu0 %v1958_v26 }
  0x34   :  { %1898 = vmatprep.subr.bf16.mxu1 %v1959_v27  ;;  %828 = vmatprep.subr.bf16.mxu0 %v1959_v27 }
  0x37   :  { %1914 = vmatpush2.bf16.msra.mxu1 %v1961_v28  ;;  %829 = vmatpush2.bf16.msra.mxu0 %v1961_v28 }
  0x38   :  { %1899 = vmatprep.subr.bf16.mxu1 %v1962_v30  ;;  %830 = vmatprep.subr.bf16.mxu0 %v1962_v30 }
  0x3b   :  { %1915 = vmatpush2.bf16.msra.mxu1 %v1964_v31  ;;  %831 = vmatpush2.bf16.msra.mxu0 %v1964_v31 }
  0x3c   :  { %1900 = vmatprep.subr.bf16.mxu1 %v1965_v32  ;;  %832 = vmatprep.subr.bf16.mxu0 %v1965_v32 }
  0x3f   :  { %1916 = vmatpush2.bf16.msra.mxu1 %v1967_v33  ;;  %833 = vmatpush2.bf16.msra.mxu0 %v1967_v33 }
  0x40   :  { %995 = vmatprep.subr.bf16.mxu1 %v1973_v34 }
  0x42   :  { %915 = vmatmul.mubr.bf16.vlgmr.msra.gmra.mxu1 %v1968_v35  ;;  %835 = vmatmul.mubr.bf16.vlgmr.msra.gmra.mxu0 %v2033_v37 }
  0x43   :  { %996 = vmatpush1.bf16.msra.mxu1 %v1971_v36  ;;  %924 = vmatprep.mubr.bf16.mxu1 %v1977_v38 }
  0x44   :  { %997 = vmatprep.subr.bf16.mxu1 %v1976_v39  ;;  %844 = vmatprep.mubr.bf16.mxu0 %v2046_v40 }
  0x47   :  { %998 = vmatpush1.bf16.msra.mxu1 %v1974_v41 }
  0x48   :  { %999 = vmatprep.subr.bf16.mxu1 %v1982_v42 }
  0x4a   :  { %925 = vmatmul.mubr.bf16.gmra.mxu1 %v1979_v43  ;;  %845 = vmatmul.mubr.bf16.gmra.mxu0 %v2048_v45 }
  0x4b   :  { %1000 = vmatpush1.bf16.msra.mxu1 %v1980_v44  ;;  %934 = vmatprep.mubr.bf16.mxu1 %v1986_v46 }
  0x4c   :  { %1001 = vmatprep.subr.bf16.mxu1 %v1985_v47  ;;  %854 = vmatprep.mubr.bf16.mxu0 %v2051_v48 }
  0x4f   :  { %1002 = vmatpush1.bf16.msra.mxu1 %v1983_v49 }
  0x50   :  { %1003 = vmatprep.subr.bf16.mxu1 %v1991_v51 }
  0x52   :  { %935 = vmatmul.mubr.bf16.gmra.mxu1 %v1988_v50  ;;  %855 = vmatmul.mubr.bf16.gmra.mxu0 %v2054_v55 }
  0x53   :  { %1004 = vmatpush1.bf16.msra.mxu1 %v1989_v52  ;;  %944 = vmatprep.mubr.bf16.mxu1 %v1995_v53 }
  0x54   :  { %1005 = vmatprep.subr.bf16.mxu1 %v1994_v54  ;;  %864 = vmatprep.mubr.bf16.mxu0 %v2057_v56 }
  0x57   :  { %1006 = vmatpush1.bf16.msra.mxu1 %v1992_v57 }
  0x58   :  { %1007 = vmatprep.subr.bf16.mxu1 %v2000_v58 }
  0x5a   :  { %945 = vmatmul.mubr.bf16.gmra.mxu1 %v1997_v59  ;;  %865 = vmatmul.mubr.bf16.gmra.mxu0 %v2060_v60 }
  0x5b   :  { %1008 = vmatpush1.bf16.msra.mxu1 %v1998_v61  ;;  %954 = vmatprep.mubr.bf16.mxu1 %v2004_v62 }
  0x5c   :  { %1009 = vmatprep.subr.bf16.mxu1 %v2003_v63  ;;  %874 = vmatprep.mubr.bf16.mxu0 %v2063_v0 }
  0x5d   :  { %10 = vsyncpa [#allocation3], 0  ;;  %v2007_v5 = vld [vmem:[%s2889_s1 + $0x1f0] ss:$8 sps:$4 sm:$0xff]   ;;  %v2013_v6 = vld [vmem:[%s2888_s0 + $0x1a4] ss:$16 sps:$4 sm:$0xff]  }
  0x5e   :  { %v2012_v7 = vld [vmem:[%s2889_s1 + $0x1e4] ss:$8 sps:$4 sm:$0xff]   ;;  %v2010_v9 = vld [vmem:[%s2889_s1 + $0x1e0] ss:$8 sps:$4 sm:$0xff]   ;;  %v2018_v10 = vld [vmem:[%s2889_s1 + $0x1d4] ss:$8 sps:$4 sm:$0xff]  }
  0x5f   :  { %1010 = vmatpush1.bf16.msra.mxu1 %v2001_v1  ;;  %v2069_v8 = vld [vmem:[%s2888_s0 + $0xa4] ss:$16 sps:$4 sm:$0xff]   ;;  %v2015_v11 = vld [vmem:[%s2888_s0 + $0x1a0] ss:$16 sps:$4 sm:$0xff]   ;;  %v2045_v30 = vld [vmem:[%s2888_s0 + $0xc] ss:$16 sps:$4 sm:$0xff]  }
  0x60   :  { %1011 = vmatprep.subr.bf16.mxu1 %v2009_v2  ;;  %v2072_v12 = vld [vmem:[%s2888_s0 + $0xa0] ss:$16 sps:$4 sm:$0xff]   ;;  %v2022_v14 = vld [vmem:[%s2888_s0 + $0x1c4] ss:$16 sps:$4 sm:$0xff]   ;;  %v2043_v33 = vld [vmem:[%s2888_s0 + $0x8] ss:$16 sps:$4 sm:$0xff]  }
  0x61   :  { %v2016_v13 = vld [vmem:[%s2889_s1 + $0x1d0] ss:$8 sps:$4 sm:$0xff]   ;;  %v2021_v15 = vld [vmem:[%s2889_s1 + $0x1c4] ss:$8 sps:$4 sm:$0xff]   ;;  %v2019_v17 = vld [vmem:[%s2889_s1 + $0x1c0] ss:$8 sps:$4 sm:$0xff]  }
  0x62   :  { %955 = vmatmul.mubr.bf16.gmra.mxu1 %v2006_v3  ;;  %875 = vmatmul.mubr.bf16.gmra.mxu0 %v2066_v4  ;;  %v2075_v16 = vld [vmem:[%s2888_s0 + $0xc4] ss:$16 sps:$4 sm:$0xff]   ;;  %v2024_v19 = vld [vmem:[%s2888_s0 + $0x1c0] ss:$16 sps:$4 sm:$0xff]   ;;  %v2049_v34 = vld [vmem:[%s2888_s0 + $0x2c] ss:$16 sps:$4 sm:$0xff]  }
  0x63   :  { %1012 = vmatpush2.bf16.msra.mxu1 %v2007_v5  ;;  %964 = vmatprep.mubr.bf16.mxu1 %v2013_v6  ;;  %v2027_v18 = vld [vmem:[%s2889_s1 + $0x1b4] ss:$8 sps:$4 sm:$0xff]   ;;  %v2078_v20 = vld [vmem:[%s2888_s0 + $0xc0] ss:$16 sps:$4 sm:$0xff]   ;;  %v2030_v23 = vld [vmem:[%s2889_s1 + $0x1a4] ss:$8 sps:$4 sm:$0xff]  }
  0x64   :  { %1013 = vmatprep.subr.bf16.mxu1 %v2012_v7  ;;  %884 = vmatprep.mubr.bf16.mxu0 %v2069_v8  ;;  %v2025_v21 = vld [vmem:[%s2889_s1 + $0x1b0] ss:$8 sps:$4 sm:$0xff]   ;;  %v2031_v22 = vld [vmem:[%s2888_s0 + $0x1e4] ss:$16 sps:$4 sm:$0xff]   ;;  %v2028_v25 = vld [vmem:[%s2889_s1 + $0x1a0] ss:$8 sps:$4 sm:$0xff]  }
  0x65   :  { %v2081_v24 = vld [vmem:[%s2888_s0 + $0xe4] ss:$16 sps:$4 sm:$0xff]   ;;  %v2036_v27 = vld [vmem:[%s2888_s0 + $0x1e0] ss:$16 sps:$4 sm:$0xff]   ;;  %v2053_v35 = vld [vmem:[%s2888_s0 + $0x28] ss:$16 sps:$4 sm:$0xff]  }
  0x66   :  { %v2039_v26 = vld [vmem:[%s2889_s1 + $0x194] ss:$8 sps:$4 sm:$0xff]   ;;  %v2084_v28 = vld [vmem:[%s2888_s0 + $0xe0] ss:$16 sps:$4 sm:$0xff]   ;;  %v2042_v31 = vld [vmem:[%s2889_s1 + $0x184] ss:$8 sps:$4 sm:$0xff]  }
  0x67   :  { %1014 = vmatpush2.bf16.msra.mxu1 %v2010_v9  ;;  %v2037_v29 = vld [vmem:[%s2889_s1 + $0x190] ss:$8 sps:$4 sm:$0xff]   ;;  %v2040_v32 = vld [vmem:[%s2889_s1 + $0x180] ss:$8 sps:$4 sm:$0xff]   ;;  %v2055_v36 = vld [vmem:[%s2888_s0 + $0x4c] ss:$16 sps:$4 sm:$0xff]  }
  0x68   :  { %1015 = vmatprep.subr.bf16.mxu1 %v2018_v10  ;;  %v2059_v37 = vld [vmem:[%s2888_s0 + $0x48] ss:$16 sps:$4 sm:$0xff]   ;;  %v2061_v38 = vld [vmem:[%s2888_s0 + $0x6c] ss:$16 sps:$4 sm:$0xff]   ;;  %v2114_v43 = vld [vmem:[%s2891_s3 + $0x70] sm:$0xff]  }
  0x69   :  { %v2112_v39 = vld [vmem:[%s2891_s3 + $0x78] sm:$0xff]   ;;  %v2115_v44 = vld [vmem:[%s2891_s3 + $0x30] sm:$0xff]   ;;  %v2116_v47 = vld [vmem:[%s2891_s3 + $0x68] sm:$0xff]  }
  0x6a   :  { %965 = vmatmul.mubr.bf16.gmra.mxu1 %v2015_v11  ;;  %885 = vmatmul.mubr.bf16.gmra.mxu0 %v2072_v12  ;;  %v2113_v40 = vld [vmem:[%s2891_s3 + $0x38] sm:$0xff]   ;;  %v2117_v48 = vld [vmem:[%s2891_s3 + $0x28] sm:$0xff]   ;;  %v2118_v51 = vld [vmem:[%s2891_s3 + $0x60] sm:$0xff]  }
  0x6b   :  { %1016 = vmatpush2.bf16.msra.mxu1 %v2016_v13  ;;  %974 = vmatprep.mubr.bf16.mxu1 %v2022_v14  ;;  %v2065_v41 = vld [vmem:[%s2888_s0 + $0x68] ss:$16 sps:$4 sm:$0xff]   ;;  %v2067_v42 = vld [vmem:[%s2888_s0 + $0x8c] ss:$16 sps:$4 sm:$0xff]   ;;  %v2119_v52 = vld [vmem:[%s2891_s3 + $0x20] sm:$0xff]  }
  0x6c   :  { %1017 = vmatprep.subr.bf16.mxu1 %v2021_v15  ;;  %894 = vmatprep.mubr.bf16.mxu0 %v2075_v16  ;;  %v2071_v45 = vld [vmem:[%s2888_s0 + $0x88] ss:$16 sps:$4 sm:$0xff]   ;;  %v2073_v46 = vld [vmem:[%s2888_s0 + $0xac] ss:$16 sps:$4 sm:$0xff]   ;;  %v2122_v59 = vld [vmem:[%s2891_s3 + $0x50] sm:$0xff]   ;;  %v152_v15 = vlaneseq }
  0x6d   :  { %1773 = vmatprep.subr.bf16.mxu0 %v2112_v39  ;;  %v2077_v49 = vld [vmem:[%s2888_s0 + $0xa8] ss:$16 sps:$4 sm:$0xff]   ;;  %v2079_v50 = vld [vmem:[%s2888_s0 + $0xcc] ss:$16 sps:$4 sm:$0xff]   ;;  %v2123_v60 = vld [vmem:[%s2891_s3 + $0x10] sm:$0xff]  }
  0x6e   :  { %1774 = vmatpush3.bf16.msra.mxu0 %v2113_v40  ;;  %v2083_v53 = vld [vmem:[%s2888_s0 + $0xc8] ss:$16 sps:$4 sm:$0xff]   ;;  %v2085_v54 = vld [vmem:[%s2888_s0 + $0xec] ss:$16 sps:$4 sm:$0xff]   ;;  %v2126_v3 = vld [vmem:[%s2891_s3 + $0x40] sm:$0xff]  }
  0x6f   :  { %1018 = vmatpush2.bf16.msra.mxu1 %v2019_v17  ;;  %1775 = vmatprep.subr.bf16.mxu0 %v2114_v43  ;;  %v2120_v55 = vld [vmem:[%s2891_s3 + $0x58] sm:$0xff]   ;;  %v2124_v63 = vld [vmem:[%s2891_s3 + $0x48] sm:$0xff]   ;;  %v2127_v4 = vld [vmem:[%s2891_s3] sm:$0xff]   ;;  %v153_v17 = vshrl.u32 %v152_v15, 7 }
  0x70   :  { %1019 = vmatprep.subr.bf16.mxu1 %v2027_v18  ;;  %v2121_v56 = vld [vmem:[%s2891_s3 + $0x18] sm:$0xff]   ;;  %v2125_v0 = vld [vmem:[%s2891_s3 + $0x8] sm:$0xff]  }
  0x71   :  { %v2087_v57 = vld [vmem:[%s2888_s0 + $0xe8] ss:$16 sps:$4 sm:$0xff]   ;;  %v2088_v58 = vld [vmem:[%s2888_s0 + $0x10c] ss:$16 sps:$4 sm:$0xff]   ;;  %v154_v18 = vsub.s32 0, %v153_v17 }
  0x72   :  { %975 = vmatmul.mubr.bf16.gmra.mxu1 %v2024_v19  ;;  %895 = vmatmul.mubr.bf16.gmra.mxu0 %v2078_v20  ;;  %v2090_v61 = vld [vmem:[%s2888_s0 + $0x108] ss:$16 sps:$4 sm:$0xff]   ;;  %v2091_v62 = vld [vmem:[%s2888_s0 + $0x12c] ss:$16 sps:$4 sm:$0xff]   ;;  %v150_v19 = vld [vmem:[%s2890_s2] sm:$0x3] }
  0x73   :  { %1020 = vmatpush2.bf16.msra.mxu1 %v2025_v21  ;;  %984 = vmatprep.mubr.bf16.mxu1 %v2031_v22  ;;  %v2093_v1 = vld [vmem:[%s2888_s0 + $0x128] ss:$16 sps:$4 sm:$0xff]   ;;  %v2094_v2 = vld [vmem:[%s2888_s0 + $0x14c] ss:$16 sps:$4 sm:$0xff]   ;;  %v158_v20 = vsub.s32 1, %v153_v17  ;;  %v2618_v21 = vrot.slane %v150_v19, %v154_v18 }
  0x74   :  { %1021 = vmatprep.subr.bf16.mxu1 %v2030_v23  ;;  %904 = vmatprep.mubr.bf16.mxu0 %v2081_v24  ;;  %v2096_v5 = vld [vmem:[%s2888_s0 + $0x148] ss:$16 sps:$4 sm:$0xff]   ;;  %v2097_v6 = vld [vmem:[%s2888_s0 + $0x16c] ss:$16 sps:$4 sm:$0xff]  }
  0x75   :  { %1776 = vmatpush3.bf16.msra.mxu0 %v2115_v44  ;;  %v2099_v7 = vld [vmem:[%s2888_s0 + $0x168] ss:$16 sps:$4 sm:$0xff]   ;;  %v2100_v8 = vld [vmem:[%s2888_s0 + $0x18c] ss:$16 sps:$4 sm:$0xff]   ;;  %v2620_v22 = vrot.slane %v150_v19, %v158_v20 }
  0x76   :  { %1777 = vmatprep.subr.bf16.mxu0 %v2116_v47  ;;  %v2102_v9 = vld [vmem:[%s2888_s0 + $0x188] ss:$16 sps:$4 sm:$0xff]   ;;  %v2103_v10 = vld [vmem:[%s2888_s0 + $0x1ac] ss:$16 sps:$4 sm:$0xff]  }
  0x77   :  { %1022 = vmatpush2.bf16.msra.mxu1 %v2028_v25  ;;  %v2105_v11 = vld [vmem:[%s2888_s0 + $0x1a8] ss:$16 sps:$4 sm:$0xff]   ;;  %v2106_v12 = vld [vmem:[%s2888_s0 + $0x1cc] ss:$16 sps:$4 sm:$0xff]  }
  0x78   :  { %1023 = vmatprep.subr.bf16.mxu1 %v2039_v26  ;;  %v2108_v13 = vld [vmem:[%s2888_s0 + $0x1c8] ss:$16 sps:$4 sm:$0xff]   ;;  %v2109_v14 = vld [vmem:[%s2888_s0 + $0x1ec] ss:$16 sps:$4 sm:$0xff]  }
  0x79   :  { %1778 = vmatpush3.bf16.msra.mxu0 %v2117_v48  ;;  %v2111_v16 = vld [vmem:[%s2888_s0 + $0x1e8] ss:$16 sps:$4 sm:$0xff]  }
  0x7a   :  { %985 = vmatmul.mubr.bf16.gmra.mxu1 %v2036_v27  ;;  %905 = vmatmul.mubr.bf16.gmra.mxu0 %v2084_v28 }
  0x7b   :  { %1024 = vmatpush2.bf16.msra.mxu1 %v2037_v29  ;;  %1027 = vmatprep.mubr.bf16.mxu1 %v2045_v30 }
  0x7c   :  { %1025 = vmatprep.subr.bf16.mxu1 %v2042_v31  ;;  %1779 = vmatprep.subr.bf16.mxu0 %v2118_v51 }
  0x7d   :  { %1780 = vmatpush3.bf16.msra.mxu0 %v2119_v52 }
  0x7e   :  { %1781 = vmatprep.subr.bf16.mxu0 %v2120_v55 }
  0x7f   :  { %1026 = vmatpush2.bf16.msra.mxu1 %v2040_v32 }
  0x81   :  { %1782 = vmatpush3.bf16.msra.mxu0 %v2121_v56 }
  0x82   :  { %1028 = vmatmul.mubr.bf16.vlgmr.msra.gmra.mxu1 %v2043_v33  ;;  %1783 = vmatprep.subr.bf16.mxu0 %v2122_v59 }
  0x83   :  { %1037 = vmatprep.mubr.bf16.mxu1 %v2049_v34 }
  0x85   :  { %1784 = vmatpush3.bf16.msra.mxu0 %v2123_v60 }
  0x86   :  { %1785 = vmatprep.subr.bf16.mxu0 %v2124_v63 }
  0x89   :  { %1786 = vmatpush3.bf16.msra.mxu0 %v2125_v0 }
  0x8a   :  { %1038 = vmatmul.mubr.bf16.gmra.mxu1 %v2053_v35  ;;  %1787 = vmatprep.subr.bf16.mxu0 %v2126_v3 }
  0x8b   :  { %1047 = vmatprep.mubr.bf16.mxu1 %v2055_v36 }
  0x8d   :  { %1788 = vmatpush3.bf16.msra.mxu0 %v2127_v4 }
  0x92   :  { %1048 = vmatmul.mubr.bf16.gmra.mxu1 %v2059_v37 }
  0x93   :  { %1057 = vmatprep.mubr.bf16.mxu1 %v2061_v38 }
  0x9a   :  { %1058 = vmatmul.mubr.bf16.gmra.mxu1 %v2065_v41 }
  0x9b   :  { %1067 = vmatprep.mubr.bf16.mxu1 %v2067_v42 }
  0xa2   :  { %1068 = vmatmul.mubr.bf16.gmra.mxu1 %v2071_v45 }
  0xa3   :  { %1077 = vmatprep.mubr.bf16.mxu1 %v2073_v46 }
  0xaa   :  { %1078 = vmatmul.mubr.bf16.gmra.mxu1 %v2077_v49 }
  0xab   :  { %1087 = vmatprep.mubr.bf16.mxu1 %v2079_v50 }
  0xb2   :  { %1088 = vmatmul.mubr.bf16.gmra.mxu1 %v2083_v53 }
  0xb3   :  { %1097 = vmatprep.mubr.bf16.mxu1 %v2085_v54 }
  0xba   :  { %1098 = vmatmul.mubr.bf16.gmra.mxu1 %v2087_v57 }
  0xbb   :  { %1107 = vmatprep.mubr.bf16.mxu1 %v2088_v58 }
  0xc2   :  { %1108 = vmatmul.mubr.bf16.gmra.mxu1 %v2090_v61 }
  0xc3   :  { %1117 = vmatprep.mubr.bf16.mxu1 %v2091_v62 }
  0xca   :  { %1118 = vmatmul.mubr.bf16.gmra.mxu1 %v2093_v1 }
  0xcb   :  { %1127 = vmatprep.mubr.bf16.mxu1 %v2094_v2 }
  0xd2   :  { %1128 = vmatmul.mubr.bf16.gmra.mxu1 %v2096_v5 }
  0xd3   :  { %1137 = vmatprep.mubr.bf16.mxu1 %v2097_v6 }
  0xda   :  { %1138 = vmatmul.mubr.bf16.gmra.mxu1 %v2099_v7 }
  0xdb   :  { %1147 = vmatprep.mubr.bf16.mxu1 %v2100_v8 }
  0xe2   :  { %1148 = vmatmul.mubr.bf16.gmra.mxu1 %v2102_v9 }
  0xe3   :  { %1157 = vmatprep.mubr.bf16.mxu1 %v2103_v10 }
  0xea   :  { %1158 = vmatmul.mubr.bf16.gmra.mxu1 %v2105_v11 }
  0xeb   :  { %1167 = vmatprep.mubr.bf16.mxu1 %v2106_v12 }
  0xf2   :  { %1168 = vmatmul.mubr.bf16.gmra.mxu1 %v2108_v13 }
  0xf3   :  { %1177 = vmatprep.mubr.bf16.mxu1 %v2109_v14 }
  0xfa   :  { %1178 = vmatmul.mubr.bf16.gmra.mxu1 %v2111_v16 }
 0x102   :  { %v916_v23 = vpop.f32.mrf.mxu1  ;;  %v2622_v24 = vpop.f32.mrf.mxu0 }
 0x103   :  { %v2625_v25 = vadd.f32 %v916_v23, %v2618_v21 }
 0x104   :  { %v918_v26 = vpop.f32.mrf.mxu1  ;;  %v2627_v27 = vpop.f32.mrf.mxu0 }
 0x105   :  { %v2630_v28 = vadd.f32 %v918_v26, %v2620_v22 }
 0x106   :  { %v920_v29 = vpop.f32.mrf.mxu1  ;;  %v2635_v32 = vpop.f32.mrf.mxu0 }
 0x107   :  { %v2633_v30 = vadd.f32 %v920_v29, %v2618_v21 }
 0x108   :  { %v922_v31 = vpop.f32.mrf.mxu1  ;;  %v2643_v37 = vpop.f32.mrf.mxu0 }
 0x109   :  { %v2638_v33 = vadd.f32 %v922_v31, %v2620_v22 }
 0x10a   :  { %v926_v34 = vpop.f32.mrf.mxu1  ;;  %v2651_v42 = vpop.f32.mrf.mxu0 }
 0x10b   :  { %v2641_v35 = vadd.f32 %v926_v34, %v2618_v21 }
 0x10c   :  { %v928_v36 = vpop.f32.mrf.mxu1  ;;  %v2659_v47 = vpop.f32.mrf.mxu0 }
 0x10d   :  { %v2646_v38 = vadd.f32 %v928_v36, %v2620_v22 }
 0x10e   :  { %v930_v39 = vpop.f32.mrf.mxu1  ;;  %v2667_v52 = vpop.f32.mrf.mxu0 }
 0x10f   :  { %v2649_v40 = vadd.f32 %v930_v39, %v2618_v21 }
 0x110   :  { %v932_v41 = vpop.f32.mrf.mxu1  ;;  %v2675_v57 = vpop.f32.mrf.mxu0 }
 0x111   :  { %v2654_v43 = vadd.f32 %v932_v41, %v2620_v22 }
 0x112   :  { %v936_v44 = vpop.f32.mrf.mxu1  ;;  %v2683_v62 = vpop.f32.mrf.mxu0 }
 0x113   :  { %v2657_v45 = vadd.f32 %v936_v44, %v2618_v21 }
 0x114   :  { %v938_v46 = vpop.f32.mrf.mxu1  ;;  %v2691_v3 = vpop.f32.mrf.mxu0 }
 0x115   :  { %v2662_v48 = vadd.f32 %v938_v46, %v2620_v22 }
 0x116   :  { %v940_v49 = vpop.f32.mrf.mxu1  ;;  %v2699_v8 = vpop.f32.mrf.mxu0 }
 0x117   :  { %v2665_v50 = vadd.f32 %v940_v49, %v2618_v21 }
 0x118   :  { %v942_v51 = vpop.f32.mrf.mxu1  ;;  %v2707_v13 = vpop.f32.mrf.mxu0 }
 0x119   :  { %v2670_v53 = vadd.f32 %v942_v51, %v2620_v22 }
 0x11a   :  { %v946_v54 = vpop.f32.mrf.mxu1  ;;  %v2715_v18 = vpop.f32.mrf.mxu0 }
 0x11b   :  { %v2673_v55 = vadd.f32 %v946_v54, %v2618_v21 }
 0x11c   :  { %v948_v56 = vpop.f32.mrf.mxu1  ;;  %v2723_v29 = vpop.f32.mrf.mxu0 }
 0x11d   :  { %v2678_v58 = vadd.f32 %v948_v56, %v2620_v22 }
 0x11e   :  { %v950_v59 = vpop.f32.mrf.mxu1  ;;  %v2731_v41 = vpop.f32.mrf.mxu0 }
 0x11f   :  { %v2681_v60 = vadd.f32 %v950_v59, %v2618_v21 }
 0x120   :  { %v952_v61 = vpop.f32.mrf.mxu1  ;;  %v2739_v54 = vpop.f32.mrf.mxu0 }
 0x121   :  { %v2686_v63 = vadd.f32 %v952_v61, %v2620_v22 }
 0x122   :  { %v956_v0 = vpop.f32.mrf.mxu1 }
 0x123   :  { %v2689_v1 = vadd.f32 %v956_v0, %v2618_v21 }
 0x124   :  { %v958_v2 = vpop.f32.mrf.mxu1 }
 0x125   :  { %v2694_v4 = vadd.f32 %v958_v2, %v2620_v22  ;;  %v2747_v2 = vpop.f32.mrf.mxu0 }
 0x126   :  { %v960_v5 = vpop.f32.mrf.mxu1 }
 0x127   :  { %v2697_v6 = vadd.f32 %v960_v5, %v2618_v21 }
 0x128   :  { %v962_v7 = vpop.f32.mrf.mxu1 }
 0x129   :  { %v2702_v9 = vadd.f32 %v962_v7, %v2620_v22 }
 0x12a   :  { %v966_v10 = vpop.f32.mrf.mxu1 }
 0x12b   :  { %v2705_v11 = vadd.f32 %v966_v10, %v2618_v21  ;;  %v837_v10 = vadd.f32 %v2622_v24, %v2618_v21 }
 0x12c   :  { %v968_v12 = vpop.f32.mrf.mxu1 }
 0x12d   :  { %v2710_v14 = vadd.f32 %v968_v12, %v2620_v22 }
 0x12e   :  { %v970_v15 = vpop.f32.mrf.mxu1 }
 0x12f   :  { %v2713_v16 = vadd.f32 %v970_v15, %v2618_v21  ;;  %v2754_v15 = vpop.f32.mrf.mxu0 }
 0x130   :  { %v972_v17 = vpop.f32.mrf.mxu1 }
 0x131   :  { %v2718_v19 = vadd.f32 %v972_v17, %v2620_v22  ;;  %v839_v17 = vadd.f32 %v2627_v27, %v2620_v22  ;;  %v847_v27 = vadd.f32 %v2651_v42, %v2618_v21 }
 0x132   :  { %v976_v20 = vpop.f32.mrf.mxu1 }
 0x133   :  { %v2721_v23 = vadd.f32 %v976_v20, %v2618_v21  ;;  %v841_v20 = vadd.f32 %v2635_v32, %v2618_v21 }
 0x134   :  { %v978_v26 = vpop.f32.mrf.mxu1 }
 0x135   :  { %v2726_v31 = vadd.f32 %v978_v26, %v2620_v22 }
 0x136   :  { %v980_v34 = vpop.f32.mrf.mxu1 }
 0x137   :  { %2894 = vst [vmem:[#allocation5_spill] sm:$0xff] %v2726_v31  ;;  %v2729_v36 = vadd.f32 %v980_v34, %v2618_v21  ;;  %v843_v34 = vadd.f32 %v2643_v37, %v2620_v22  ;;  %v849_v37 = vadd.f32 %v2659_v47, %v2620_v22 }
 0x138   :  { %v982_v39 = vpop.f32.mrf.mxu1 }
 0x139   :  { %2895 = vst [vmem:[#allocation6_spill] sm:$0xff] %v2729_v36  ;;  %v2734_v44 = vadd.f32 %v982_v39, %v2620_v22 }
 0x13a   :  { %v986_v46 = vpop.f32.mrf.mxu1 }
 0x13b   :  { %2896 = vst [vmem:[#allocation7_spill] sm:$0xff] %v2734_v44  ;;  %v2737_v49 = vadd.f32 %v986_v46, %v2618_v21 }
 0x13c   :  { %v988_v51 = vpop.f32.mrf.mxu1 }
 0x13d   :  { %2897 = vst [vmem:[#allocation8_spill] sm:$0xff] %v2737_v49  ;;  %v2742_v56 = vadd.f32 %v988_v51, %v2620_v22 }
 0x13e   :  { %v990_v59 = vpop.f32.mrf.mxu1 }
 0x13f   :  { %2898 = vst [vmem:[#allocation9_spill] sm:$0xff] %v2742_v56  ;;  %v2745_v61 = vadd.f32 %v990_v59, %v2618_v21 }
 0x140   :  { %v992_v0 = vpop.f32.mrf.mxu1 }
 0x141   :  { %2899 = vst [vmem:[#allocation10_spill] sm:$0xff] %v2745_v61  ;;  %v2750_v5 = vadd.f32 %v992_v0, %v2620_v22  ;;  %v2762_v0 = vpop.f32.mrf.mxu0 }
 0x142   :  { %v1029_v7 = vpop.f32.mrf.mxu1 }
 0x143   :  { %2900 = vst [vmem:[#allocation11_spill] sm:$0xff] %v2750_v5  ;;  %v1030_v51 = vadd.f32 %v1029_v7, %v837_v10  ;;  %v2766_v36 = vpop.f32.mrf.mxu0  ;;  %v851_v7 = vadd.f32 %v2667_v52, %v2618_v21 }
 0x144   :  { %v1031_v12 = vpop.f32.mrf.mxu1 }
 0x145   :  { %v1032_v39 = vadd.f32 %v1031_v12, %v839_v17  ;;  %v1188_v44 = vmax.f32 %v1030_v51, 0.0 }
 0x146   :  { %v1033_v26 = vpop.f32.mrf.mxu1 }
 0x147   :  { %v1034_v46 = vadd.f32 %v1033_v26, %v841_v20  ;;  %v1189_v56 = vmax.f32 %v1032_v39, 0.0  ;;  %v853_v20 = vadd.f32 %v2675_v57, %v2620_v22  ;;  %v859_v57 = vadd.f32 %v2691_v3, %v2620_v22 }
 0x148   :  { %v1035_v59 = vpop.f32.mrf.mxu1 }
 0x149   :  { %v1036_v24 = vadd.f32 %v1035_v59, %v843_v34  ;;  %v1190_v5 = vmax.f32 %v1034_v46, 0.0  ;;  %v2774_v46 = vpop.f32.mrf.mxu0 }
 0x14a   :  { %v1039_v61 = vpop.f32.mrf.mxu1 }
 0x14b   :  { %v1191_v49 = vmax.f32 %v1036_v24, 0.0  ;;  %v1252_v12 = vpack.c.bf16 %v1190_v5, %v1188_v44  ;;  %v1040_v39 = vadd.f32 %v1039_v61, %v847_v27  ;;  %v857_v44 = vadd.f32 %v2683_v62, %v2618_v21 }
 0x14c   :  { %v1041_v32 = vpop.f32.mrf.mxu1  ;;  %v861_v61 = vadd.f32 %v2699_v8, %v2618_v21  ;;  %v867_v8 = vadd.f32 %v2715_v18, %v2618_v21 }
 0x14d   :  { %v1253_v10 = vpack.c.bf16 %v1191_v49, %v1189_v56  ;;  %v1042_v26 = vadd.f32 %v1041_v32, %v849_v37  ;;  %v1192_v52 = vmax.f32 %v1040_v39, 0.0  ;;  %v2778_v56 = vpop.f32.mrf.mxu0  ;;  %v863_v37 = vadd.f32 %v2707_v13, %v2620_v22 }
 0x14e   :  { %v1043_v17 = vpop.f32.mrf.mxu1  ;;  %v869_v13 = vadd.f32 %v2723_v29, %v2620_v22 }
 0x14f   :  { %v1044_v34 = vadd.f32 %v1043_v17, %v851_v7  ;;  %1451 = vmatprep.mubr.bf16.mxu0 %v1253_v10  ;;  %v1193_v24 = vmax.f32 %v1042_v26, 0.0  ;;  %v890_v17 = vpop.f32.mrf.mxu0 }
 0x150   :  { %v1045_v42 = vpop.f32.mrf.mxu1  ;;  %1452 = vmatmul.mubr.bf16.vlgmr.msra.gmra.mxu0 %v1252_v12 }
 0x151   :  { %v1046_v51 = vadd.f32 %v1045_v42, %v853_v20  ;;  %v1194_v59 = vmax.f32 %v1044_v34, 0.0 }
 0x152   :  { %v1049_v47 = vpop.f32.mrf.mxu1 }
 0x153   :  { %v1195_v31 = vmax.f32 %v1046_v51, 0.0  ;;  %v1254_v27 = vpack.c.bf16 %v1194_v59, %v1192_v52  ;;  %v1050_v12 = vadd.f32 %v1049_v47, %v857_v44  ;;  %v892_v51 = vpop.f32.mrf.mxu0  ;;  %v871_v59 = vadd.f32 %v2731_v41, %v2618_v21 }
 0x154   :  { %v1051_v49 = vpop.f32.mrf.mxu1  ;;  %v873_v44 = vadd.f32 %v2739_v54, %v2620_v22  ;;  %v877_v41 = vadd.f32 %v2747_v2, %v2618_v21  ;;  %v879_v54 = vadd.f32 %v2754_v15, %v2620_v22 }
 0x155   :  { %v1255_v5 = vpack.c.bf16 %v1195_v31, %v1193_v24  ;;  %v1052_v7 = vadd.f32 %v1051_v49, %v859_v57  ;;  %v1196_v42 = vmax.f32 %v1050_v12, 0.0  ;;  %v896_v18 = vpop.f32.mrf.mxu0 }
 0x156   :  { %v1053_v32 = vpop.f32.mrf.mxu1 }
 0x157   :  { %v1054_v10 = vadd.f32 %v1053_v32, %v861_v61  ;;  %1459 = vmatprep.mubr.bf16.mxu0 %v1255_v5  ;;  %v1197_v3 = vmax.f32 %v1052_v7, 0.0 }
 0x158   :  { %v1055_v62 = vpop.f32.mrf.mxu1  ;;  %1460 = vmatmul.mubr.bf16.gmra.mxu0 %v1254_v27 }
 0x159   :  { %v1056_v20 = vadd.f32 %v1055_v62, %v863_v37  ;;  %v1198_v26 = vmax.f32 %v1054_v10, 0.0  ;;  %v898_v62 = vpop.f32.mrf.mxu0 }
 0x15a   :  { %v1059_v34 = vpop.f32.mrf.mxu1 }
 0x15b   :  { %v1199_v39 = vmax.f32 %v1056_v20, 0.0  ;;  %v1256_v24 = vpack.c.bf16 %v1198_v26, %v1196_v42  ;;  %v1060_v61 = vadd.f32 %v1059_v34, %v867_v8  ;;  %v881_v20 = vadd.f32 %v2762_v0, %v2618_v21  ;;  %v900_v2 = vpop.f32.mrf.mxu0 }
 0x15c   :  { %v1061_v31 = vpop.f32.mrf.mxu1  ;;  %v887_v0 = vadd.f32 %v2774_v46, %v2618_v21 }
 0x15d   :  { %v1257_v47 = vpack.c.bf16 %v1199_v39, %v1197_v3  ;;  %v1062_v49 = vadd.f32 %v1061_v31, %v869_v13  ;;  %v1200_v10 = vmax.f32 %v1060_v61, 0.0  ;;  %v883_v39 = vadd.f32 %v2766_v36, %v2620_v22 }
 0x15e   :  { %v1063_v52 = vpop.f32.mrf.mxu1  ;;  %v889_v36 = vadd.f32 %v2778_v56, %v2620_v22  ;;  %v891_v61 = vadd.f32 %v890_v17, %v2618_v21  ;;  %v897_v17 = vadd.f32 %v896_v18, %v2618_v21 }
 0x15f   :  { %v1064_v57 = vadd.f32 %v1063_v52, %v871_v59  ;;  %1467 = vmatprep.mubr.bf16.mxu0 %v1257_v47  ;;  %v1201_v29 = vmax.f32 %v1062_v49, 0.0 }
 0x160   :  { %v1065_v5 = vpop.f32.mrf.mxu1  ;;  %1468 = vmatmul.mubr.bf16.gmra.mxu0 %v1256_v24 }
 0x161   :  { %v1066_v27 = vadd.f32 %v1065_v5, %v873_v44  ;;  %v1202_v32 = vmax.f32 %v1064_v57, 0.0  ;;  %v902_v57 = vpop.f32.mrf.mxu0 }
 0x162   :  { %v1069_v37 = vpop.f32.mrf.mxu1 }
 0x163   :  { %v1203_v7 = vmax.f32 %v1066_v27, 0.0  ;;  %v1258_v34 = vpack.c.bf16 %v1202_v32, %v1200_v10  ;;  %v1070_v31 = vadd.f32 %v1069_v37, %v877_v41  ;;  %v893_v37 = vadd.f32 %v892_v51, %v2620_v22 }
 0x164   :  { %v1071_v12 = vpop.f32.mrf.mxu1  ;;  %v901_v51 = vadd.f32 %v900_v2, %v2618_v21 }
 0x165   :  { %v1259_v26 = vpack.c.bf16 %v1203_v7, %v1201_v29  ;;  %v1072_v42 = vadd.f32 %v1071_v12, %v879_v54  ;;  %v1204_v44 = vmax.f32 %v1070_v31, 0.0  ;;  %v906_v12 = vpop.f32.mrf.mxu0 }
 0x166   :  { %v1073_v3 = vpop.f32.mrf.mxu1  ;;  %v907_v2 = vadd.f32 %v906_v12, %v2618_v21 }
 0x167   :  { %v1074_v8 = vadd.f32 %v1073_v3, %v881_v20  ;;  %1475 = vmatprep.mubr.bf16.mxu0 %v1259_v26  ;;  %v1205_v15 = vmax.f32 %v1072_v42, 0.0  ;;  %v899_v42 = vadd.f32 %v898_v62, %v2620_v22 }
 0x168   :  { %v1075_v13 = vpop.f32.mrf.mxu1  ;;  %1476 = vmatmul.mubr.bf16.gmra.mxu0 %v1258_v34 }
 0x169   :  { %v1076_v59 = vadd.f32 %v1075_v13, %v883_v39  ;;  %v1206_v47 = vmax.f32 %v1074_v8, 0.0  ;;  %v908_v39 = vpop.f32.mrf.mxu0 }
 0x16a   :  { %v1079_v24 = vpop.f32.mrf.mxu1 }
 0x16b   :  { %v1207_v52 = vmax.f32 %v1076_v59, 0.0  ;;  %v1260_v27 = vpack.c.bf16 %v1206_v47, %v1204_v44  ;;  %v1080_v10 = vadd.f32 %v1079_v24, %v887_v0  ;;  %v903_v59 = vadd.f32 %v902_v57, %v2620_v22 }
 0x16c   :  { %v1081_v49 = vpop.f32.mrf.mxu1 }
 0x16d   :  { %v1261_v5 = vpack.c.bf16 %v1207_v52, %v1205_v15  ;;  %v1082_v29 = vadd.f32 %v1081_v49, %v889_v36  ;;  %v1208_v56 = vmax.f32 %v1080_v10, 0.0  ;;  %v910_v52 = vpop.f32.mrf.mxu0 }
 0x16e   :  { %v1083_v32 = vpop.f32.mrf.mxu1  ;;  %v911_v57 = vadd.f32 %v910_v52, %v2618_v21 }
 0x16f   :  { %v1084_v7 = vadd.f32 %v1083_v32, %v891_v61  ;;  %1483 = vmatprep.mubr.bf16.mxu0 %v1261_v5  ;;  %v1209_v26 = vmax.f32 %v1082_v29, 0.0  ;;  %v912_v5 = vpop.f32.mrf.mxu0  ;;  %v909_v32 = vadd.f32 %v908_v39, %v2620_v22 }
 0x170   :  { %v1085_v41 = vpop.f32.mrf.mxu1  ;;  %1484 = vmatmul.mubr.bf16.gmra.mxu0 %v1260_v27  ;;  %v913_v10 = vadd.f32 %v912_v5, %v2620_v22 }
 0x171   :  { %v1086_v46 = vadd.f32 %v1085_v41, %v893_v37  ;;  %v1210_v54 = vmax.f32 %v1084_v7, 0.0 }
 0x172   :  { %v1089_v20 = vpop.f32.mrf.mxu1 }
 0x173   :  { %v1211_v34 = vmax.f32 %v1086_v46, 0.0  ;;  %v1262_v31 = vpack.c.bf16 %v1210_v54, %v1208_v56  ;;  %v1090_v15 = vadd.f32 %v1089_v20, %v897_v17 }
 0x174   :  { %v1091_v3 = vpop.f32.mrf.mxu1 }
 0x175   :  { %v1263_v8 = vpack.c.bf16 %v1211_v34, %v1209_v26  ;;  %v1092_v47 = vadd.f32 %v1091_v3, %v899_v42  ;;  %v1212_v62 = vmax.f32 %v1090_v15, 0.0 }
 0x176   :  { %v1093_v13 = vpop.f32.mrf.mxu1 }
 0x177   :  { %v1094_v24 = vadd.f32 %v1093_v13, %v901_v51  ;;  %1491 = vmatprep.mubr.bf16.mxu0 %v1263_v8  ;;  %v1213_v36 = vmax.f32 %v1092_v47, 0.0 }
 0x178   :  { %v1095_v44 = vpop.f32.mrf.mxu1  ;;  %1492 = vmatmul.mubr.bf16.gmra.mxu0 %v1262_v31 }
 0x179   :  { %v1096_v0 = vadd.f32 %v1095_v44, %v903_v59  ;;  %v1214_v18 = vmax.f32 %v1094_v24, 0.0 }
 0x17a   :  { %v1099_v49 = vpop.f32.mrf.mxu1 }
 0x17b   :  { %v1215_v61 = vmax.f32 %v1096_v0, 0.0  ;;  %v1264_v29 = vpack.c.bf16 %v1214_v18, %v1212_v62  ;;  %v1100_v54 = vadd.f32 %v1099_v49, %v907_v2 }
 0x17c   :  { %v1101_v27 = vpop.f32.mrf.mxu1 }
 0x17d   :  { %v1265_v37 = vpack.c.bf16 %v1215_v61, %v1213_v36  ;;  %v1102_v41 = vadd.f32 %v1101_v27, %v909_v32  ;;  %v1216_v3 = vmax.f32 %v1100_v54, 0.0 }
 0x17e   :  { %v1103_v7 = vpop.f32.mrf.mxu1 }
 0x17f   :  { %v1104_v46 = vadd.f32 %v1103_v7, %v911_v57  ;;  %1499 = vmatprep.mubr.bf16.mxu0 %v1265_v37  ;;  %v1217_v56 = vmax.f32 %v1102_v41, 0.0 }
 0x180   :  { %v1105_v20 = vpop.f32.mrf.mxu1  ;;  %1500 = vmatmul.mubr.bf16.gmra.mxu0 %v1264_v29 }
 0x181   :  { %v1106_v26 = vadd.f32 %v1105_v20, %v913_v10  ;;  %v1218_v34 = vmax.f32 %v1104_v46, 0.0 }
 0x182   :  { %v1109_v12 = vpop.f32.mrf.mxu1 }
 0x183   :  { %v1219_v17 = vmax.f32 %v1106_v26, 0.0  ;;  %v1110_v21 = vadd.f32 %v1109_v12, %v2625_v25  ;;  %v1266_v51 = vpack.c.bf16 %v1218_v34, %v1216_v3 }
 0x184   :  { %v1111_v39 = vpop.f32.mrf.mxu1 }
 0x185   :  { %v1267_v42 = vpack.c.bf16 %v1219_v17, %v1217_v56  ;;  %v1112_v22 = vadd.f32 %v1111_v39, %v2630_v28  ;;  %v1220_v59 = vmax.f32 %v1110_v21, 0.0 }
 0x186   :  { %v1113_v8 = vpop.f32.mrf.mxu1 }
 0x187   :  { %v1114_v31 = vadd.f32 %v1113_v8, %v2633_v30  ;;  %1507 = vmatprep.mubr.bf16.mxu0 %v1267_v42  ;;  %v1221_v52 = vmax.f32 %v1112_v22, 0.0 }
 0x188   :  { %v1115_v13 = vpop.f32.mrf.mxu1  ;;  %1508 = vmatmul.mubr.bf16.gmra.mxu0 %v1266_v51 }
 0x189   :  { %v1222_v47 = vmax.f32 %v1114_v31, 0.0  ;;  %v1116_v24 = vadd.f32 %v1115_v13, %v2638_v33 }
 0x18a   :  { %v1119_v15 = vpop.f32.mrf.mxu1 }
 0x18b   :  { %v1268_v44 = vpack.c.bf16 %v1222_v47, %v1220_v59  ;;  %v1223_v0 = vmax.f32 %v1116_v24, 0.0  ;;  %v1120_v25 = vadd.f32 %v1119_v15, %v2641_v35 }
 0x18c   :  { %v1121_v18 = vpop.f32.mrf.mxu1 }
 0x18d   :  { %v1269_v49 = vpack.c.bf16 %v1223_v0, %v1221_v52  ;;  %v1122_v28 = vadd.f32 %v1121_v18, %v2646_v38  ;;  %v1224_v62 = vmax.f32 %v1120_v25, 0.0 }
 0x18e   :  { %v1123_v36 = vpop.f32.mrf.mxu1 }
 0x18f   :  { %v1124_v30 = vadd.f32 %v1123_v36, %v2649_v40  ;;  %1515 = vmatprep.mubr.bf16.mxu0 %v1269_v49  ;;  %v1225_v27 = vmax.f32 %v1122_v28, 0.0 }
 0x190   :  { %v1125_v61 = vpop.f32.mrf.mxu1  ;;  %1516 = vmatmul.mubr.bf16.gmra.mxu0 %v1268_v44 }
 0x191   :  { %v1226_v2 = vmax.f32 %v1124_v30, 0.0  ;;  %v1126_v33 = vadd.f32 %v1125_v61, %v2654_v43 }
 0x192   :  { %v1129_v5 = vpop.f32.mrf.mxu1 }
 0x193   :  { %v1270_v32 = vpack.c.bf16 %v1226_v2, %v1224_v62  ;;  %v1227_v57 = vmax.f32 %v1126_v33, 0.0  ;;  %v1130_v35 = vadd.f32 %v1129_v5, %v2657_v45 }
 0x194   :  { %v1131_v37 = vpop.f32.mrf.mxu1 }
 0x195   :  { %v1271_v29 = vpack.c.bf16 %v1227_v57, %v1225_v27  ;;  %v1132_v38 = vadd.f32 %v1131_v37, %v2662_v48  ;;  %v1228_v41 = vmax.f32 %v1130_v35, 0.0  ;;  %v2901_v37 = vld [vmem:[#allocation5_spill] sm:$0xff] }
 0x196   :  { %v1133_v7 = vpop.f32.mrf.mxu1 }
 0x197   :  { %v1134_v40 = vadd.f32 %v1133_v7, %v2665_v50  ;;  %1523 = vmatprep.mubr.bf16.mxu0 %v1271_v29  ;;  %v1229_v20 = vmax.f32 %v1132_v38, 0.0  ;;  %v2902_v29 = vld [vmem:[#allocation6_spill] sm:$0xff] }
 0x198   :  { %v1135_v10 = vpop.f32.mrf.mxu1  ;;  %1524 = vmatmul.mubr.bf16.gmra.mxu0 %v1270_v32 }
 0x199   :  { %v1230_v46 = vmax.f32 %v1134_v40, 0.0  ;;  %v1136_v43 = vadd.f32 %v1135_v10, %v2670_v53  ;;  %v2903_v40 = vld [vmem:[#allocation7_spill] sm:$0xff] }
 0x19a   :  { %v1139_v54 = vpop.f32.mrf.mxu1 }
 0x19b   :  { %v1272_v26 = vpack.c.bf16 %v1230_v46, %v1228_v41  ;;  %v1231_v34 = vmax.f32 %v1136_v43, 0.0  ;;  %v1140_v45 = vadd.f32 %v1139_v54, %v2673_v55 }
 0x19c   :  { %v1141_v12 = vpop.f32.mrf.mxu1 }
 0x19d   :  { %v1273_v56 = vpack.c.bf16 %v1231_v34, %v1229_v20  ;;  %v1142_v48 = vadd.f32 %v1141_v12, %v2678_v58  ;;  %v1232_v39 = vmax.f32 %v1140_v45, 0.0  ;;  %v2905_v12 = vld [vmem:[#allocation9_spill] sm:$0xff]  ;;  %v2906_v45 = vld [vmem:[#allocation10_spill] sm:$0xff] }
 0x19e   :  { %v1143_v17 = vpop.f32.mrf.mxu1 }
 0x19f   :  { %v1144_v50 = vadd.f32 %v1143_v17, %v2681_v60  ;;  %1531 = vmatprep.mubr.bf16.mxu0 %v1273_v56  ;;  %v1233_v51 = vmax.f32 %v1142_v48, 0.0 }
 0x1a0   :  { %v1145_v3 = vpop.f32.mrf.mxu1  ;;  %1532 = vmatmul.mubr.bf16.gmra.mxu0 %v1272_v26  ;;  %v2904_v26 = vld [vmem:[#allocation8_spill] sm:$0xff] }
 0x1a1   :  { %v1234_v42 = vmax.f32 %v1144_v50, 0.0  ;;  %v1146_v53 = vadd.f32 %v1145_v3, %v2686_v63 }
 0x1a2   :  { %v1149_v21 = vpop.f32.mrf.mxu1 }
 0x1a3   :  { %v1274_v8 = vpack.c.bf16 %v1234_v42, %v1232_v39  ;;  %v1235_v22 = vmax.f32 %v1146_v53, 0.0  ;;  %v1150_v55 = vadd.f32 %v1149_v21, %v2689_v1  ;;  %v2907_v39 = vld [vmem:[#allocation11_spill] sm:$0xff] }
 0x1a4   :  { %v1151_v31 = vpop.f32.mrf.mxu1 }
 0x1a5   :  { %v1275_v13 = vpack.c.bf16 %v1235_v22, %v1233_v51  ;;  %v1152_v58 = vadd.f32 %v1151_v31, %v2694_v4  ;;  %v1236_v24 = vmax.f32 %v1150_v55, 0.0  ;;  %v2851_v31 = vld [vmem:[%s2892_s4] ss:$0 sm:$0xff]  ;;  %s2150_s4 = smov [#allocation2]  }
 0x1a6   :  { %v1153_v59 = vpop.f32.mrf.mxu1  ;;  %s1617_s28 = sshll.u32 %s2150_s4, 4  ;;  %s1618_s28 = int_to_ptr.vmem [resolvable:$true] %s1617_s28 }
 0x1a7   :  { %v1154_v60 = vadd.f32 %v1153_v59, %v2697_v6  ;;  %1539 = vmatprep.mubr.bf16.mxu0 %v1275_v13  ;;  %v1237_v44 = vmax.f32 %v1152_v58, 0.0  ;;  %s2128_s29 = scalar_lea.vmem %s1618_s28, 4096  ;;  %p2133_p1 = scmp.lt.s32.totalorder %s1618_s28, %s1618_s28 }
 0x1a8   :  { %v1155_v47 = vpop.f32.mrf.mxu1  ;;  %1540 = vmatmul.mubr.bf16.gmra.mxu0 %v1274_v8  ;;  %p2129_p0 = scmp.ne.s32.totalorder %s1618_s28, %s2128_s29  ;;  %p2134_p2 = scmp.lt.s32.totalorder %s2128_s29, %s2128_s29 }
 0x1a9   :  { %v1238_v15 = vmax.f32 %v1154_v60, 0.0  ;;  %v1156_v63 = vadd.f32 %v1155_v47, %v2702_v9 }
 0x1aa   :  { %v1159_v52 = vpop.f32.mrf.mxu1  ;;  %p2135_p3 = por %p2134_p2, %p2133_p1 }
 0x1ab   :  { %v1276_v0 = vpack.c.bf16 %v1238_v15, %v1236_v24  ;;  %v1239_v18 = vmax.f32 %v1156_v63, 0.0  ;;  %v1160_v1 = vadd.f32 %v1159_v52, %v2705_v11 }
 0x1ac   :  { %v1161_v49 = vpop.f32.mrf.mxu1  ;;  %p2136_p4 = pnand %p2135_p3, %p2129_p0 }
 0x1ad   :  { %v1277_v25 = vpack.c.bf16 %v1239_v18, %v1237_v44  ;;  %v1162_v4 = vadd.f32 %v1161_v49, %v2710_v14  ;;  %v1240_v30 = vmax.f32 %v1160_v1, 0.0 }
 0x1ae   :  { %v1163_v36 = vpop.f32.mrf.mxu1 }
 0x1af   :  { %v1164_v6 = vadd.f32 %v1163_v36, %v2713_v16  ;;  %1547 = vmatprep.mubr.bf16.mxu0 %v1277_v25  ;;  %v1241_v2 = vmax.f32 %v1162_v4, 0.0 }
 0x1b0   :  { %v1165_v28 = vpop.f32.mrf.mxu1  ;;  %1548 = vmatmul.mubr.bf16.gmra.mxu0 %v1276_v0 }
 0x1b1   :  { %v1242_v61 = vmax.f32 %v1164_v6, 0.0  ;;  %v1166_v9 = vadd.f32 %v1165_v28, %v2718_v19 }
 0x1b2   :  { %v1169_v62 = vpop.f32.mrf.mxu1 }
 0x1b3   :  { %v1278_v33 = vpack.c.bf16 %v1242_v61, %v1240_v30  ;;  %v1243_v5 = vmax.f32 %v1166_v9, 0.0  ;;  %v1170_v11 = vadd.f32 %v1169_v62, %v2721_v23 }
 0x1b4   :  { %v1171_v27 = vpop.f32.mrf.mxu1 }
 0x1b5   :  { %v1279_v32 = vpack.c.bf16 %v1243_v5, %v1241_v2  ;;  %v1172_v14 = vadd.f32 %v1171_v27, %v2901_v37  ;;  %v1244_v7 = vmax.f32 %v1170_v11, 0.0 }
 0x1b6   :  { %v1173_v57 = vpop.f32.mrf.mxu1 }
 0x1b7   :  { %v1174_v16 = vadd.f32 %v1173_v57, %v2902_v29  ;;  %1555 = vmatprep.mubr.bf16.mxu0 %v1279_v32  ;;  %v1245_v41 = vmax.f32 %v1172_v14, 0.0 }
 0x1b8   :  { %v1175_v35 = vpop.f32.mrf.mxu1  ;;  %1556 = vmatmul.mubr.bf16.gmra.mxu0 %v1278_v33 }
 0x1b9   :  { %v1246_v38 = vmax.f32 %v1174_v16, 0.0  ;;  %v1176_v19 = vadd.f32 %v1175_v35, %v2903_v40 }
 0x1ba   :  { %v1179_v10 = vpop.f32.mrf.mxu1 }
 0x1bb   :  { %v1280_v46 = vpack.c.bf16 %v1246_v38, %v1244_v7  ;;  %v1247_v43 = vmax.f32 %v1176_v19, 0.0  ;;  %v1180_v23 = vadd.f32 %v1179_v10, %v2904_v26 }
 0x1bc   :  { %v1181_v54 = vpop.f32.mrf.mxu1 }
 0x1bd   :  { %v1281_v20 = vpack.c.bf16 %v1247_v43, %v1245_v41  ;;  %v1182_v56 = vadd.f32 %v1181_v54, %v2905_v12  ;;  %v1248_v50 = vmax.f32 %v1180_v23, 0.0 }
 0x1be   :  { %v1183_v34 = vpop.f32.mrf.mxu1 }
 0x1bf   :  { %v1184_v17 = vadd.f32 %v1183_v34, %v2906_v45  ;;  %1563 = vmatprep.mubr.bf16.mxu0 %v1281_v20  ;;  %v1249_v53 = vmax.f32 %v1182_v56, 0.0 }
 0x1c0   :  { %v1185_v48 = vpop.f32.mrf.mxu1  ;;  %1564 = vmatmul.mubr.bf16.gmra.mxu0 %v1280_v46 }
 0x1c1   :  { %v1250_v3 = vmax.f32 %v1184_v17, 0.0  ;;  %v1186_v42 = vadd.f32 %v1185_v48, %v2907_v39 }
 0x1c3   :  { %v1282_v21 = vpack.c.bf16 %v1250_v3, %v1248_v50  ;;  %v1251_v51 = vmax.f32 %v1186_v42, 0.0 }
 0x1c5   :  { %v1283_v8 = vpack.c.bf16 %v1251_v51, %v1249_v53 }
 0x1c7   :  { %1571 = vmatprep.mubr.bf16.mxu0 %v1283_v8 }
 0x1c8   :  { %1572 = vmatmul.mubr.bf16.gmra.mxu0 %v1282_v21 }
 0x210   :  { %v1789_v22 = vpop.f32.mrf.mxu0 }
 0x212   :  { %v1790_v13 = vpop.f32.mrf.mxu0 }
 0x213   :  { %v1791_v55 = vadd.f32 %v1790_v13, %v1789_v22 }
 0x214   :  { %v1792_v59 = vpop.f32.mrf.mxu0 }
 0x215   :  { %v1454_v58 = vadd.f32 %v1791_v55, %v2851_v31 }
 0x216   :  { %v1793_v60 = vpop.f32.mrf.mxu0 }
 0x217   :  { %1580 = vst [vmem:[#allocation2] sm:$0xff] %v1454_v58  ;;  %v1794_v47 = vadd.f32 %v1793_v60, %v1792_v59 }
 0x218   :  { %v1795_v24 = vpop.f32.mrf.mxu0 }
 0x219   :  { %v1457_v15 = vadd.f32 %v1794_v47, %v2851_v31 }
 0x21a   :  { %v1796_v63 = vpop.f32.mrf.mxu0 }
 0x21b   :  { %1581 = vst [vmem:[#allocation2 + $0x8] sm:$0xff] %v1457_v15  ;;  %v1797_v52 = vadd.f32 %v1796_v63, %v1795_v24 }
 0x21c   :  { %v1798_v44 = vpop.f32.mrf.mxu0 }
 0x21d   :  { %v1462_v0 = vadd.f32 %v1797_v52, %v2851_v31 }
 0x21e   :  { %v1799_v18 = vpop.f32.mrf.mxu0 }
 0x21f   :  { %1582 = vst [vmem:[#allocation2 + $0x10] sm:$0xff] %v1462_v0  ;;  %v1800_v49 = vadd.f32 %v1799_v18, %v1798_v44 }
 0x220   :  { %v1801_v25 = vpop.f32.mrf.mxu0 }
 0x221   :  { %v1465_v1 = vadd.f32 %v1800_v49, %v2851_v31 }
 0x222   :  { %v1802_v36 = vpop.f32.mrf.mxu0 }
 0x223   :  { %1583 = vst [vmem:[#allocation2 + $0x18] sm:$0xff] %v1465_v1  ;;  %v1803_v4 = vadd.f32 %v1802_v36, %v1801_v25 }
 0x224   :  { %v1804_v6 = vpop.f32.mrf.mxu0 }
 0x225   :  { %v1470_v28 = vadd.f32 %v1803_v4, %v2851_v31 }
 0x226   :  { %v1805_v30 = vpop.f32.mrf.mxu0 }
 0x227   :  { %1584 = vst [vmem:[#allocation2 + $0x20] sm:$0xff] %v1470_v28  ;;  %v1806_v61 = vadd.f32 %v1805_v30, %v1804_v6 }
 0x228   :  { %v1807_v9 = vpop.f32.mrf.mxu0 }
 0x229   :  { %v1473_v62 = vadd.f32 %v1806_v61, %v2851_v31 }
 0x22a   :  { %v1808_v2 = vpop.f32.mrf.mxu0 }
 0x22b   :  { %1585 = vst [vmem:[#allocation2 + $0x28] sm:$0xff] %v1473_v62  ;;  %v1809_v33 = vadd.f32 %v1808_v2, %v1807_v9 }
 0x22c   :  { %v1810_v5 = vpop.f32.mrf.mxu0 }
 0x22d   :  { %v1478_v27 = vadd.f32 %v1809_v33, %v2851_v31 }
 0x22e   :  { %v1811_v32 = vpop.f32.mrf.mxu0 }
 0x22f   :  { %1586 = vst [vmem:[#allocation2 + $0x30] sm:$0xff] %v1478_v27  ;;  %v1812_v11 = vadd.f32 %v1811_v32, %v1810_v5 }
 0x230   :  { %v1813_v57 = vpop.f32.mrf.mxu0 }
 0x231   :  { %v1481_v37 = vadd.f32 %v1812_v11, %v2851_v31 }
 0x232   :  { %v1814_v14 = vpop.f32.mrf.mxu0 }
 0x233   :  { %1587 = vst [vmem:[#allocation2 + $0x38] sm:$0xff] %v1481_v37  ;;  %v1815_v29 = vadd.f32 %v1814_v14, %v1813_v57 }
 0x234   :  { %v1816_v16 = vpop.f32.mrf.mxu0 }
 0x235   :  { %v1486_v35 = vadd.f32 %v1815_v29, %v2851_v31 }
 0x236   :  { %v1817_v7 = vpop.f32.mrf.mxu0 }
 0x237   :  { %1588 = vst [vmem:[#allocation2 + $0x40] sm:$0xff] %v1486_v35  ;;  %v1818_v38 = vadd.f32 %v1817_v7, %v1816_v16 }
 0x238   :  { %v1819_v40 = vpop.f32.mrf.mxu0 }
 0x239   :  { %v1489_v19 = vadd.f32 %v1818_v38, %v2851_v31 }
 0x23a   :  { %v1820_v10 = vpop.f32.mrf.mxu0 }
 0x23b   :  { %1589 = vst [vmem:[#allocation2 + $0x48] sm:$0xff] %v1489_v19  ;;  %v1821_v41 = vadd.f32 %v1820_v10, %v1819_v40 }
 0x23c   :  { %v1822_v46 = vpop.f32.mrf.mxu0 }
 0x23d   :  { %v1494_v43 = vadd.f32 %v1821_v41, %v2851_v31 }
 0x23e   :  { %v1823_v54 = vpop.f32.mrf.mxu0 }
 0x23f   :  { %1590 = vst [vmem:[#allocation2 + $0x50] sm:$0xff] %v1494_v43  ;;  %v1824_v20 = vadd.f32 %v1823_v54, %v1822_v46 }
 0x240   :  { %v1825_v26 = vpop.f32.mrf.mxu0 }
 0x241   :  { %v1497_v23 = vadd.f32 %v1824_v20, %v2851_v31 }
 0x242   :  { %v1826_v34 = vpop.f32.mrf.mxu0 }
 0x243   :  { %1591 = vst [vmem:[#allocation2 + $0x58] sm:$0xff] %v1497_v23  ;;  %v1827_v12 = vadd.f32 %v1826_v34, %v1825_v26 }
 0x244   :  { %v1828_v56 = vpop.f32.mrf.mxu0 }
 0x245   :  { %v1502_v45 = vadd.f32 %v1827_v12, %v2851_v31 }
 0x246   :  { %v1829_v17 = vpop.f32.mrf.mxu0 }
 0x247   :  { %1592 = vst [vmem:[#allocation2 + $0x60] sm:$0xff] %v1502_v45  ;;  %v1830_v48 = vadd.f32 %v1829_v17, %v1828_v56 }
 0x248   :  { %v1831_v50 = vpop.f32.mrf.mxu0 }
 0x249   :  { %v1505_v3 = vadd.f32 %v1830_v48, %v2851_v31 }
 0x24a   :  { %v1832_v39 = vpop.f32.mrf.mxu0 }
 0x24b   :  { %1593 = vst [vmem:[#allocation2 + $0x68] sm:$0xff] %v1505_v3  ;;  %v1833_v42 = vadd.f32 %v1832_v39, %v1831_v50 }
 0x24c   :  { %v1834_v53 = vpop.f32.mrf.mxu0 }
 0x24d   :  { %v1510_v21 = vadd.f32 %v1833_v42, %v2851_v31 }
 0x24e   :  { %v1835_v51 = vpop.f32.mrf.mxu0 }
 0x24f   :  { %1594 = vst [vmem:[#allocation2 + $0x70] sm:$0xff] %v1510_v21  ;;  %v1836_v8 = vadd.f32 %v1835_v51, %v1834_v53 }
 0x250   :  { %v1837_v22 = vpop.f32.mrf.mxu0 }
 0x251   :  { %v1513_v13 = vadd.f32 %v1836_v8, %v2851_v31 }
 0x252   :  { %v1838_v55 = vpop.f32.mrf.mxu0 }
 0x253   :  { %1595 = vst [vmem:[#allocation2 + $0x78] sm:$0xff] %v1513_v13  ;;  %v1839_v59 = vadd.f32 %v1838_v55, %v1837_v22 }
 0x254   :  { %v1840_v58 = vpop.f32.mrf.mxu0 }
 0x255   :  { %v1518_v60 = vadd.f32 %v1839_v59, %v2851_v31 }
 0x256   :  { %v1841_v47 = vpop.f32.mrf.mxu0 }
 0x257   :  { %1596 = vst [vmem:[#allocation2 + $0x80] sm:$0xff] %v1518_v60  ;;  %v1842_v24 = vadd.f32 %v1841_v47, %v1840_v58 }
 0x258   :  { %v1843_v15 = vpop.f32.mrf.mxu0 }
 0x259   :  { %v1521_v63 = vadd.f32 %v1842_v24, %v2851_v31 }
 0x25a   :  { %v1844_v52 = vpop.f32.mrf.mxu0 }
 0x25b   :  { %1597 = vst [vmem:[#allocation2 + $0x88] sm:$0xff] %v1521_v63  ;;  %v1845_v44 = vadd.f32 %v1844_v52, %v1843_v15 }
 0x25c   :  { %v1846_v0 = vpop.f32.mrf.mxu0 }
 0x25d   :  { %v1526_v18 = vadd.f32 %v1845_v44, %v2851_v31 }
 0x25e   :  { %v1847_v49 = vpop.f32.mrf.mxu0 }
 0x25f   :  { %1598 = vst [vmem:[#allocation2 + $0x90] sm:$0xff] %v1526_v18  ;;  %v1848_v25 = vadd.f32 %v1847_v49, %v1846_v0 }
 0x260   :  { %v1849_v1 = vpop.f32.mrf.mxu0 }
 0x261   :  { %v1529_v36 = vadd.f32 %v1848_v25, %v2851_v31 }
 0x262   :  { %v1850_v4 = vpop.f32.mrf.mxu0 }
 0x263   :  { %1599 = vst [vmem:[#allocation2 + $0x98] sm:$0xff] %v1529_v36  ;;  %v1851_v6 = vadd.f32 %v1850_v4, %v1849_v1 }
 0x264   :  { %v1852_v28 = vpop.f32.mrf.mxu0 }
 0x265   :  { %v1534_v30 = vadd.f32 %v1851_v6, %v2851_v31 }
 0x266   :  { %v1853_v61 = vpop.f32.mrf.mxu0 }
 0x267   :  { %1600 = vst [vmem:[#allocation2 + $0xa0] sm:$0xff] %v1534_v30  ;;  %v1854_v9 = vadd.f32 %v1853_v61, %v1852_v28 }
 0x268   :  { %v1855_v62 = vpop.f32.mrf.mxu0 }
 0x269   :  { %v1537_v2 = vadd.f32 %v1854_v9, %v2851_v31 }
 0x26a   :  { %v1856_v33 = vpop.f32.mrf.mxu0 }
 0x26b   :  { %1601 = vst [vmem:[#allocation2 + $0xa8] sm:$0xff] %v1537_v2  ;;  %v1857_v5 = vadd.f32 %v1856_v33, %v1855_v62 }
 0x26c   :  { %v1858_v27 = vpop.f32.mrf.mxu0 }
 0x26d   :  { %v1542_v32 = vadd.f32 %v1857_v5, %v2851_v31 }
 0x26e   :  { %v1859_v11 = vpop.f32.mrf.mxu0 }
 0x26f   :  { %1602 = vst [vmem:[#allocation2 + $0xb0] sm:$0xff] %v1542_v32  ;;  %v1860_v57 = vadd.f32 %v1859_v11, %v1858_v27 }
 0x270   :  { %v1861_v37 = vpop.f32.mrf.mxu0 }
 0x271   :  { %v1545_v14 = vadd.f32 %v1860_v57, %v2851_v31 }
 0x272   :  { %v1862_v29 = vpop.f32.mrf.mxu0 }
 0x273   :  { %1603 = vst [vmem:[#allocation2 + $0xb8] sm:$0xff] %v1545_v14  ;;  %v1863_v16 = vadd.f32 %v1862_v29, %v1861_v37 }
 0x274   :  { %v1864_v35 = vpop.f32.mrf.mxu0 }
 0x275   :  { %v1550_v7 = vadd.f32 %v1863_v16, %v2851_v31 }
 0x276   :  { %v1865_v38 = vpop.f32.mrf.mxu0 }
 0x277   :  { %1604 = vst [vmem:[#allocation2 + $0xc0] sm:$0xff] %v1550_v7  ;;  %v1866_v40 = vadd.f32 %v1865_v38, %v1864_v35 }
 0x278   :  { %v1867_v19 = vpop.f32.mrf.mxu0 }
 0x279   :  { %v1553_v10 = vadd.f32 %v1866_v40, %v2851_v31 }
 0x27a   :  { %v1868_v41 = vpop.f32.mrf.mxu0 }
 0x27b   :  { %1605 = vst [vmem:[#allocation2 + $0xc8] sm:$0xff] %v1553_v10  ;;  %v1869_v46 = vadd.f32 %v1868_v41, %v1867_v19 }
 0x27c   :  { %v1870_v43 = vpop.f32.mrf.mxu0 }
 0x27d   :  { %v1558_v54 = vadd.f32 %v1869_v46, %v2851_v31 }
 0x27e   :  { %v1871_v20 = vpop.f32.mrf.mxu0 }
 0x27f   :  { %1606 = vst [vmem:[#allocation2 + $0xd0] sm:$0xff] %v1558_v54  ;;  %v1872_v26 = vadd.f32 %v1871_v20, %v1870_v43 }
 0x280   :  { %v1873_v23 = vpop.f32.mrf.mxu0 }
 0x281   :  { %v1561_v34 = vadd.f32 %v1872_v26, %v2851_v31 }
 0x282   :  { %v1874_v12 = vpop.f32.mrf.mxu0 }
 0x283   :  { %1607 = vst [vmem:[#allocation2 + $0xd8] sm:$0xff] %v1561_v34  ;;  %v1875_v56 = vadd.f32 %v1874_v12, %v1873_v23 }
 0x284   :  { %v1876_v45 = vpop.f32.mrf.mxu0 }
 0x285   :  { %v1566_v17 = vadd.f32 %v1875_v56, %v2851_v31 }
 0x286   :  { %v1877_v48 = vpop.f32.mrf.mxu0 }
 0x287   :  { %1608 = vst [vmem:[#allocation2 + $0xe0] sm:$0xff] %v1566_v17  ;;  %v1878_v50 = vadd.f32 %v1877_v48, %v1876_v45 }
 0x288   :  { %v1879_v3 = vpop.f32.mrf.mxu0 }
 0x289   :  { %v1569_v39 = vadd.f32 %v1878_v50, %v2851_v31 }
 0x28a   :  { %v1880_v42 = vpop.f32.mrf.mxu0 }
 0x28b   :  { %1609 = vst [vmem:[#allocation2 + $0xe8] sm:$0xff] %v1569_v39  ;;  %v1881_v53 = vadd.f32 %v1880_v42, %v1879_v3 }
 0x28c   :  { %v1882_v21 = vpop.f32.mrf.mxu0 }
 0x28d   :  { %v1574_v51 = vadd.f32 %v1881_v53, %v2851_v31 }
 0x28e   :  { %v1883_v8 = vpop.f32.mrf.mxu0 }
 0x28f   :  { %1610 = vst [vmem:[#allocation2 + $0xf0] sm:$0xff] %v1574_v51  ;;  %v1884_v22 = vadd.f32 %v1883_v8, %v1882_v21 }
 0x291   :  { %v1577_v13 = vadd.f32 %v1884_v22, %v2851_v31 }
 0x293   :  { %1611 = vst [vmem:[#allocation2 + $0xf8] sm:$0xff] %v1577_v13 }
 0x294   :  { %2139 = shalt.err (!%p2136_p4)
}
 0x295   :  { %s2151_s30 = smov 128   ;;  %s2152_s6 = smov 8  }
 0x296   :  { %1623 = dma.vmem_to_hbm [thread:$0]  %s1618_s28, 4096, %s2893_s5, [#allocation3], %s2151_s30, %s2151_s30, %s2152_s6  }
 0x297   :  { %2148 = dma.done.wait [#allocation3], 4096  }
 0x298   :  { %2149 = vsyncadd [#allocation3], 4294963200 }
 0x299   :  { %1627 = vsyncpa [#allocation3], 1 }

</bundles_post_ra>
